<compile_context>
chip_gen: v7x
topology: tpu7x:2x2x1
jax: 0.10.0
libtpu: 0.0.40
codegen_flags: <defaults>
</compile_context>

<pallas_src>
import functools

import jax
import jax.numpy as jnp
from jax.experimental import pallas as pl
from jax.experimental.pallas import tpu as pltpu

# ---- module hyper-parameters (mirrors __init__ with up_factor=2) ----------------
UP_FACTOR = 2
assert UP_FACTOR % 2 == 0
_NEEDED_KERNEL_SIZE = UP_FACTOR * 2
_NEEDED_PADDING = UP_FACTOR // 2
STRIDE = UP_FACTOR                                    # self.stride
PADDING = _NEEDED_KERNEL_SIZE - _NEEDED_PADDING - 1   # self.padding (= 2)
INTERNAL_PADDING = STRIDE - 1                         # self.internal_padding


def _up_pre_kernel(xc_ref, xp_ref, o_ref, *, h, w, c, s, p, tq, prev_rows):
    """One (batch, output-row-block) grid step.

    xc_ref: (1, tq, w*c)          current input row tile   (tile index min(j, n_in-1))
    xp_ref: (1, prev_rows, w*c)   carry window ending at the last row of tile j-1
    o_ref : (1, s*tq, W_out*c)    lane-dense output row block j (written exactly once)
    """
    q = p // s                       # rows carried from the previous input tile (=1)
    j = pl.program_id(1)
    dt = o_ref.dtype
    W_out = s * (w - 1) + 1 + 2 * p

    # Source rows for this output block: last q rows of the previous tile followed by
    # the first tq-q rows of the current tile.  Rows whose source index falls outside
    # [0, h) (top padding of block 0, everything past the last image row in the final
    # block) are zero-masked instead of guarded stores.
    prev = xp_ref[0, prev_rows - q:prev_rows, :]                     # (q, w*c)
    cur = xc_ref[0, 0:tq - q, :]                                     # (tq-q, w*c)
    rows = jnp.concatenate([prev, cur], axis=0).astype(dt)           # (tq, w*c)
    src = jax.lax.broadcasted_iota(jnp.int32, (tq, 1), 0) + (j * tq - q)
    rows = jnp.where(jnp.logical_and(src >= 0, src < h), rows, 0.0)

    # Lane dilation: (tq, w*c) -> (tq, W_out*c): p*c leading zero lanes, each c-wide
    # channel group followed by (s-1)*c zero lanes, trailing zero lanes to W_out*c.
    r3 = rows.reshape(tq, w, c)
    gap = jnp.zeros((tq, w, (s - 1) * c), dt)
    dil = jnp.concatenate([r3, gap], axis=2).reshape(tq, w * s * c)
    lead = jnp.zeros((tq, p * c), dt)
    trail = jnp.zeros((tq, (W_out - p - s * w) * c), dt)
    full = jnp.concatenate([lead, dil, trail], axis=1)               # (tq, W_out*c)

    # Row dilation: source row r lands on block row s*r; (s-1) zero rows in between.
    zrows = jnp.zeros((tq, s - 1, W_out * c), dt)
    blk = jnp.concatenate([full.reshape(tq, 1, W_out * c), zrows], axis=1)

    # Single full-width, offset-0 store of the whole block (no zero-fill pass).
    o_ref[...] = blk.reshape(1, s * tq, W_out * c)


def up_pre_transformation(x, *, row_tile=None):
    """x: (b, h, w, c) NHWC (native dtype) -> (b, H_out, W_out, c) NHWC float32."""
    b, h, w, c = x.shape
    s, p = STRIDE, PADDING
    # Row tiling relies on the scatter offset being a whole number of strides;
    # holds for up_factor=2 (p=2, s=2).
    assert p % s == 0, "row tiling assumes PADDING % STRIDE == 0 (holds for up_factor=2)"
    q = p // s
    H_out = h + INTERNAL_PADDING * (h - 1) + 2 * p
    W_out = w + INTERNAL_PADDING * (w - 1) + 2 * p

    # Generation-aware VMEM budget for one output row block.
    try:
        vmem_cap = pltpu.get_tpu_info().vmem_capacity_bytes
    except Exception:
        vmem_cap = 64 << 20                      # conservative (v7x-sized) fallback
    out_blk_budget = (8 << 20) if vmem_cap >= (96 << 20) else (7 << 19)  # 8 / 3.5 MiB

    if row_tile is None:
        cands = [d for d in range(1, h + 1) if h % d == 0 and (d == h or d % 8 == 0)]
        fitting = [d for d in cands if s * d * W_out * c * 4 <= out_blk_budget]
        if not fitting:
            fitting = [min(cands)]
        # Keep enough parallel blocks for megacore sharding (v7x has 2 TCs).
        balanced = [d for d in fitting if b * (h // d + 1) >= 8]
        row_tile = max(balanced) if balanced else max(fitting)
    tq = row_tile
    assert h % tq == 0 and q < tq, (h, tq, q)
    n_in_tiles = h // tq
    prev_rows = 8 if tq % 8 == 0 else tq         # small sublane-aligned carry window
    blocks_per_tile = tq // prev_rows
    blk_h = s * tq
    n_out_tiles = pl.cdiv(H_out, blk_h)
    assert n_out_tiles == n_in_tiles + 1

    itemsize = x.dtype.itemsize
    needed = 2 * (blk_h * W_out * c * 4
                  + tq * w * c * itemsize
                  + prev_rows * w * c * itemsize) + (4 << 20)
    vmem_limit = int(min(max(needed, 32 << 20), vmem_cap * 3 // 4))

    xf = x.reshape(b, h, w * c)                  # free reshape -> lane-dense input
    kernel = functools.partial(
        _up_pre_kernel, h=h, w=w, c=c, s=s, p=p, tq=tq, prev_rows=prev_rows)
    out = pl.pallas_call(
        kernel,
        out_shape=jax.ShapeDtypeStruct((b, H_out, W_out * c), jnp.float32),
        grid=(b, n_out_tiles),
        in_specs=[
            # current input row tile (clamped on the trailing padding-only block)
            pl.BlockSpec((1, tq, w * c),
                         lambda i, j: (i, jnp.minimum(j, n_in_tiles - 1), 0)),
            # 8-row carry window ending at the last row of input tile j-1
            pl.BlockSpec((1, prev_rows, w * c),
                         lambda i, j: (i, jnp.maximum(j * blocks_per_tile - 1, 0), 0)),
        ],
        out_specs=pl.BlockSpec((1, blk_h, W_out * c), lambda i, j: (i, j, 0)),
        compiler_params=pltpu.CompilerParams(
            dimension_semantics=("parallel", "parallel"),
            vmem_limit_bytes=vmem_limit),
    )(xf, xf)
    return out.reshape(b, H_out, W_out, c)


def _reference(x):
    """Pure-JAX reference reproducing the PyTorch forward exactly (NHWC in/out)."""
    b, h, w, c = x.shape
    s, p = STRIDE, PADDING
    H = h + INTERNAL_PADDING * (h - 1) + 2 * p
    W = w + INTERNAL_PADDING * (w - 1) + 2 * p
    out = jnp.zeros((b, H, W, c), jnp.float32)
    return out.at[:, p:H - p:s, p:W - p:s, :].set(x.astype(jnp.float32))


if __name__ == "__main__":
    key = jax.random.PRNGKey(0)
    # NHWC input: batch=2, h=w=16, c=4 (the module permutes NHWC -> NCHW internally)
    x = jax.random.normal(key, (2, 16, 16, 4), dtype=jnp.float32)
    ref = _reference(x)

    # Default tiling (one input row tile per image at this small size).
    out = jax.block_until_ready(up_pre_transformation(x))
    assert out.shape == ref.shape and out.dtype == jnp.float32, (out.shape, out.dtype)
    assert jnp.array_equal(out, ref), "mismatch vs reference (default tiling)"

    # Explicit multi-row-tile path (exercises the cross-tile row-carry logic).
    out2 = jax.block_until_ready(up_pre_transformation(x, row_tile=8))
    assert jnp.array_equal(out2, ref), "mismatch vs reference (row_tile=8)"

    print("KERNEL_OK")
</pallas_src>

<mosaic_0001>
module attributes {stable_mosaic.version = 11 : i64} {
  func.func @_up_pre_kernel(%arg0: i32, %arg1: i32, %arg2: memref<1x16x64xf32, #tpu.memory_space<vmem>>, %arg3: memref<1x8x64xf32, #tpu.memory_space<vmem>>, %arg4: memref<1x32x140xf32, #tpu.memory_space<vmem>>) attributes {dimension_semantics = [#tpu.dimension_semantics<parallel>, #tpu.dimension_semantics<parallel>], iteration_bounds = array<i64: 2, 2>, scalar_prefetch = 0 : i64, scratch_operands = 0 : i64, tpu.core_type = #tpu.core_type<tc>, window_params = [{transform_indices = @transform_0, window_bounds = array<i64: 1, 16, 64>}, {transform_indices = @transform_1, window_bounds = array<i64: 1, 8, 64>}, {transform_indices = @transform_2, window_bounds = array<i64: 1, 32, 140>}]} {
    %c0 = arith.constant 0 : index
    %c7 = arith.constant 7 : index
    %c0_0 = arith.constant 0 : index
    %0 = vector.load %arg3[%c0, %c7, %c0_0] : memref<1x8x64xf32, #tpu.memory_space<vmem>>, vector<1x1x64xf32>
    %1 = vector.shape_cast %0 : vector<1x1x64xf32> to vector<1x64xf32>
    %c0_1 = arith.constant 0 : index
    %c0_2 = arith.constant 0 : index
    %c0_3 = arith.constant 0 : index
    %2 = vector.load %arg2[%c0_1, %c0_2, %c0_3] : memref<1x16x64xf32, #tpu.memory_space<vmem>>, vector<1x15x64xf32>
    %3 = vector.shape_cast %2 : vector<1x15x64xf32> to vector<15x64xf32>
    %4 = tpu.concatenate %1, %3 in 0 : vector<1x64xf32>, vector<15x64xf32> -> vector<16x64xf32>
    %5 = tpu.iota {dimensions = array<i32: 0>} : vector<16x1xi32>
    %c16_i32 = arith.constant 16 : i32
    %6 = arith.muli %arg1, %c16_i32 : i32
    %c1_i32 = arith.constant 1 : i32
    %7 = arith.subi %6, %c1_i32 : i32
    %8 = vector.broadcast %7 : i32 to vector<16x1xi32>
    %9 = arith.addi %5, %8 : vector<16x1xi32>
    %c0_i32 = arith.constant 0 : i32
    %10 = vector.broadcast %c0_i32 : i32 to vector<16x1xi32>
    %11 = arith.cmpi sge, %9, %10 : vector<16x1xi32>
    %c16_i32_4 = arith.constant 16 : i32
    %12 = vector.broadcast %c16_i32_4 : i32 to vector<16x1xi32>
    %13 = arith.cmpi slt, %9, %12 : vector<16x1xi32>
    %14 = arith.andi %11, %13 : vector<16x1xi1>
    %cst = arith.constant 0.000000e+00 : f32
    %15 = vector.shape_cast %14 : vector<16x1xi1> to vector<16x1xi1>
    %16 = vector.broadcast %15 : vector<16x1xi1> to vector<16x64xi1>
    %17 = vector.broadcast %cst : f32 to vector<16x64xf32>
    %18 = arith.select %16, %4, %17 : vector<16x64xi1>, vector<16x64xf32>
    %19 = vector.shape_cast %18 : vector<16x64xf32> to vector<16x16x4xf32>
    %cst_5 = arith.constant 0.000000e+00 : f32
    %20 = vector.broadcast %cst_5 : f32 to vector<16x16x4xf32>
    %21 = tpu.concatenate %19, %20 in 2 : vector<16x16x4xf32>, vector<16x16x4xf32> -> vector<16x16x8xf32>
    %22 = vector.shape_cast %21 : vector<16x16x8xf32> to vector<16x128xf32>
    %cst_6 = arith.constant 0.000000e+00 : f32
    %23 = vector.broadcast %cst_6 : f32 to vector<16x8xf32>
    %cst_7 = arith.constant 0.000000e+00 : f32
    %24 = vector.broadcast %cst_7 : f32 to vector<16x4xf32>
    %25 = tpu.concatenate %23, %22, %24 in 1 : vector<16x8xf32>, vector<16x128xf32>, vector<16x4xf32> -> vector<16x140xf32>
    %cst_8 = arith.constant 0.000000e+00 : f32
    %26 = vector.broadcast %cst_8 : f32 to vector<16x1x140xf32>
    %27 = vector.shape_cast %25 : vector<16x140xf32> to vector<16x1x140xf32>
    %28 = tpu.concatenate %27, %26 in 1 : vector<16x1x140xf32>, vector<16x1x140xf32> -> vector<16x2x140xf32>
    %29 = vector.shape_cast %28 : vector<16x2x140xf32> to vector<1x32x140xf32>
    %c0_9 = arith.constant 0 : index
    %c0_10 = arith.constant 0 : index
    %c0_11 = arith.constant 0 : index
    %30 = vector.load %arg4[%c0_9, %c0_10, %c0_11] : memref<1x32x140xf32, #tpu.memory_space<vmem>>, vector<1x32x140xf32>
    tpu.vector_store %arg4[%c0_9, %c0_10, %c0_11], %29 {strides = array<i32>} : memref<1x32x140xf32, #tpu.memory_space<vmem>>, vector<1x32x140xf32>,
    return
  }
  func.func @transform_0(%arg0: i32, %arg1: i32) -> (i32, i32, i32) {
    %c0_i32 = arith.constant 0 : i32
    %0 = arith.minsi %arg1, %c0_i32 : i32
    %c0_i32_0 = arith.constant 0 : i32
    %c0_i32_1 = arith.constant 0 : i32
    return %arg0, %0, %c0_i32_0 : i32, i32, i32
  }
  func.func @transform_1(%arg0: i32, %arg1: i32) -> (i32, i32, i32) {
    %c2_i32 = arith.constant 2 : i32
    %0 = arith.muli %arg1, %c2_i32 : i32
    %c1_i32 = arith.constant 1 : i32
    %1 = arith.subi %0, %c1_i32 : i32
    %c0_i32 = arith.constant 0 : i32
    %2 = arith.maxsi %1, %c0_i32 : i32
    %c0_i32_0 = arith.constant 0 : i32
    %c0_i32_1 = arith.constant 0 : i32
    return %arg0, %2, %c0_i32_0 : i32, i32, i32
  }
  func.func @transform_2(%arg0: i32, %arg1: i32) -> (i32, i32, i32) {
    %c0_i32 = arith.constant 0 : i32
    %c0_i32_0 = arith.constant 0 : i32
    return %arg0, %arg1, %c0_i32 : i32, i32, i32
  }
}

</mosaic_0001>

<bundles_post_ra>
// kernel: tpu_custom_call.1
= control target key start
LH: loop header
LB: loop body
LE: loop exit
PB: predicated region body
PF: predicated region fallthrough
CT: control target
= control target key end

     0   :  { %s3958_s0 = inlined_call_operand.hbm [shape: f32[2,16,64], index: 0, kind: input, shape index: {}]   ;;  %s3959_s1 = inlined_call_operand.hbm [shape: f32[2,16,64], index: 1, kind: input, shape index: {}]   ;;  %s3960_s2 = inlined_call_operand.vmem [shape: f32[2,35,140], index: 2, kind: output, shape index: {}]  }
   0x1   :  { %3970 = sst [smem:[#allocation14_spill]] %s3958_s0 }
   0x2   :  { %7 = vsyncpa [#allocation3], 0 }
   0x3   :  { %9 = vsyncpa [#allocation3 + $0x1], 0 }
   0x4   :  { %10 = vsyncpa [#allocation5], 0 }
   0x5   :  { %12 = vsyncpa [#allocation5 + $0x1], 0  ;;  %s2979_s9 = smov 0   ;;  %s2981_s10 = smov 0  }
   0x6   :  { %s2983_s11 = smov 0   ;;  %s2985_s12 = smov 0  }
   0x7   :  { %s2987_s13 = smov 0   ;;  %s2989_s14 = smov 0  }
   0x8   :  { %s2991_s15 = smov 0   ;;  %s2993_s16 = smov 0  }
   0x9   :  { %s2995_s17 = smov 0   ;;  %s2997_s18 = smov 0  }
   0xa   :  { %s2999_s19 = smov 0   ;;  %s3001_s20 = smov 0  }
   0xb   :  { %s3003_s21 = smov 0  }
   0xc LB: > { %3971 = sst [smem:[#allocation9_spill]] %s2880_s16  ;;  %s27_s22 = sadd.s32 1, %s2892_s19  ;;  %s2900_s21 = sphi %s3003_s21, %s18_s21   ;;  %s2896_s20 = sphi %s3001_s20, %s4012_s20   ;;  %s2892_s19 = sphi %s2999_s19, %s4002_s19   ;;  %s2888_s18 = sphi %s2997_s18, %s4011_s18   ;;  %s2884_s17 = sphi %s2995_s17, %s4001_s17   ;;  %s2880_s16 = sphi %s2993_s16, %s4000_s16   ;;  %s2876_s15 = sphi %s2991_s15, %s4010_s15   ;;  %s2872_s14 = sphi %s2989_s14, %s4009_s14   ;;  %s2868_s13 = sphi %s2987_s13, %s4008_s13   ;;  %s2864_s12 = sphi %s2985_s12, %s4007_s12   ;;  %s2860_s11 = sphi %s2983_s11, %s4006_s11   ;;  %s2856_s10 = sphi %s2981_s10, %s4005_s10   ;;  %s2852_s9 = sphi %s2979_s9, %s4004_s9  }
   0xd   : > { %3972 = sst [smem:[#allocation10_spill]] %s2892_s19  ;;  %p3045_p0 = scmp.ge.s32.totalorder %s27_s22, 2 }
   0xe   : > { %s43_s24 = sadd.s32 1, %s2880_s16  ;;  %p50_p1 = scmp.ne.s32.totalorder %s2880_s16, %s2876_s15 }
   0xf   : > { %s4014_s22 = smov (%p3045_p0, %s27_s22), 0  ;;  %p3962_p2 = scmp.eq.s32.totalorder %s2900_s21, 0 }
  0x10   : > { %3974 = sst [smem:[#allocation11_spill]] %s4014_s22  ;;  %p3961_p5 = scmp.lt.s32.totalorder %s2900_s21, 4 }
  0x11   : > { %p52_p4 = por %p3962_p2, %p50_p1  ;;  %s144_s25 = sand.u32 1, %s2880_s16  }
  0x12   : > { %s2450_s26 = sshll.u32 %s144_s25, 4  ;;  %s2849_s30 = sshll.u32 %s2896_s20, 8 }
  0x13   : > { %s148_s28 = scalar_lea.vmem [#allocation2], %s2450_s26  ;;  %s3975_s0 = sld [smem:[#allocation14_spill]] }
  0x14   : > { %s159_s29 = sshll.u32 %s148_s28, 4  ;;  %p3074_p6 = pnand %p3961_p5, %p52_p4  ;;  %s3065_s29 = int_to_ptr.vmem [resolvable:$true] %s159_s29 }
  0x15   : > { %s3079_s7 = scalar_lea.sflag [#allocation3], %s144_s25 }
  0x16   : > { %p2699_p9 = pneg %p3074_p6 }
  0x19   : > { %s3070_s5 = scalar_lea.hbm %s3975_s0, %s2849_s30  ;;  %s2702_s30 = scalar_lea.hbm %s3975_s0, 512 }
  0x1a   : > { %s2697_s8 = scalar_lea.hbm %s3070_s5, 256  ;;  %p2703_p12 = scmp.lt.u32.totalorder %s3070_s5, %s3975_s0 }
  0x1b   : > { %p2698_p8 = scmp.ne.s32.totalorder %s3070_s5, %s2697_s8  ;;  %p2704_p13 = scmp.lt.u32.totalorder %s2702_s30, %s2697_s8 }
  0x1c   : > { %p2706_p4 = scmp.lt.u32.totalorder %s2697_s8, %s3070_s5 }
  0x1d   : > { %p2700_p10 = pnand %p2699_p9, %p2698_p8  ;;  %p2705_p1 = por %p2704_p13, %p2703_p12 }
  0x1f   : > { %p2701_p11 = pneg %p2700_p10  ;;  %p2707_p5 = por %p2706_p4, %p2705_p1 }
  0x21   : > { %p2708_p2 = pnand %p2707_p5, %p2701_p11 }
  0x23   : > { %2711 = shalt.err (!%p2708_p2)
}
  0x24   : > { %s2712_s25 = scalar_lea.vmem %s3065_s29, 256  ;;  %s2934_s26 = smov [#allocation2]  }
  0x25   : > { %p2713_p8 = scmp.ne.s32.totalorder %s3065_s29, %s2712_s25  ;;  %s2717_s28 = sshll.u32 %s2934_s26, 4  ;;  %s2718_s28 = int_to_ptr.vmem [resolvable:$false] %s2717_s28 }
  0x26   : > { %s2719_s3 = scalar_lea.vmem %s2718_s28, 512  ;;  %p2720_p7 = scmp.lt.s32.totalorder %s3065_s29, %s2718_s28 }
  0x27   : > { %p2715_p10 = pnand %p2713_p8, %p2699_p9  ;;  %p2721_p12 = scmp.lt.s32.totalorder %s2719_s3, %s2712_s25 }
  0x29   : > { %p2716_p3 = pneg %p2715_p10  ;;  %p2722_p13 = por %p2721_p12, %p2720_p7 }
  0x2b   : > { %p2723_p1 = pnand %p2722_p13, %p2716_p3 }
  0x2d   : > { %2726 = shalt.err (!%p2723_p1)
}
  0x2e   : > { %s2935_s8 = smov 128   ;;  %s2936_s30 = smov 8  }
  0x2f   : > { %2496 = dma.hbm_to_vmem [thread:$0]  (!%p3074_p6), %s3070_s5, 256, %s3065_s29, %s3079_s7, %s2935_s8, %s2935_s8, %s2936_s30  }
  0x30   : > { %p191_p2 = scmp.lt.s32.totalorder %s2900_s21, 5  ;;  %p3977_p3 = scmp.ge.s32.totalorder %s2900_s21, 1 }
  0x31   : > { %s3963_s25 = sadd.s32 4294967295, %s2900_s21   ;;  %s30_s26 = sadd.s32 1, %s2896_s20 }
  0x32   : > { %p3110_p5 = pnand %p3977_p3, %p191_p2  ;;  %s4016_s26 = smov (!%p3045_p0, %s30_s26), %s2896_s20 }
  0x33   : > { %p3121_p7 = scmp.eq.s32.totalorder %s3963_s25, 0  ;;  %s2444_s29 = sshll.u32 %s2892_s19, 1 }
  0x34   : > { %p32_p6 = scmp.ge.s32.totalorder %s4016_s26, 2  ;;  %s2445_s5 = sadd.s32 4294967295, %s2444_s29 }
  0x35   : > { %p3980_p9 = scmp.ne.s32.totalorder %s2876_s15, %s2872_s14  ;;  %p68_p0 = scmp.gt.s32.totalorder %s2445_s5, 0 }
  0x36   : > { %s4018_s26 = smov (%p32_p6, %s4016_s26), 0  ;;  %s2446_s28 = sshll.u32 %s4014_s22, 1 }
  0x37   : > { %p3131_p11 = por %p3121_p7, %p3980_p9  ;;  %3982 = sst [smem:[#allocation12_spill]] %s4018_s26 }
  0x38   : > { %s4020_s5 = smov (!%p68_p0, %s2445_s5), 0  ;;  %s38_s7 = ssub.s32 %s2896_s20, %s4018_s26 }
  0x39   : > { %s3981_s23 = scalar_select %p3131_p11, 1, 0 }
  0x3a   : > { %s2447_s3 = sadd.s32 4294967295, %s2446_s28  ;;  %p41_p4 = scmp.eq.s32.totalorder %s38_s7, 0 }
  0x3b   : > { %p72_p8 = scmp.gt.s32.totalorder %s2447_s3, 0  ;;  %s79_s14 = sadd.s32 1, %s2868_s13 }
  0x3c   : > { %p86_p10 = scmp.ne.s32.totalorder %s2868_s13, %s2864_s12  ;;  %p3984_p12 = scmp.eq.s32.totalorder %s2900_s21, 0 }
  0x3d   : > { %s3146_s8 = scalar_select %p41_p4, %s2880_s16, %s43_s24  }
  0x3e   : > { %s4022_s3 = smov (!%p72_p8, %s2447_s3), 0  ;;  %p3150_p13 = por %p86_p10, %p3984_p12 }
  0x3f   : > { %3983 = sst [smem:[#allocation13_spill]] %s3146_s8  ;;  %p92_p1 = scmp.ne.s32.totalorder %s2864_s12, %s2860_s11 }
  0x40   : > { %s75_s29 = ssub.s32 %s4020_s5, %s4022_s3  ;;  %s103_s28 = ssub.s32 %s2892_s19, %s4014_s22 }
  0x41   : > { %s76_s27 = sor.u32 %s75_s29, %s38_s7  ;;  %p3160_p2 = por %p92_p1, %p3121_p7 }
  0x42   : > { %p77_p3 = scmp.eq.s32.totalorder %s76_s27, 0  ;;  %s104_s24 = sor.u32 %s103_s28, %s38_s7 }
  0x43   : > { %s3986_s25 = scalar_select %p3160_p2, 1, 0 }
  0x44   : > { %p105_p6 = scmp.eq.s32.totalorder %s104_s24, 0  ;;  %s107_s0 = sadd.s32 1, %s2856_s10 }
  0x45   : > { %s3166_s26 = scalar_select %p77_p3, %s2868_s13, %s79_s14  }
  0x46   : > { %s3169_s8 = scalar_select %p105_p6, %s2856_s10, %s107_s0  }
  0x47   : > { %p117_p9 = scmp.ne.s32.totalorder %s2856_s10, %s2852_s9  ;;  %s3987_s11 = sadd.s32 4294967295, %s2900_s21  }
  0x48   : > { %p118_p0 = scmp.eq.s32.totalorder %s3987_s11, 3  ;;  %s169_s3 = sand.u32 1, %s2868_s13  }
  0x49   : > { %s3988_s29 = sshll.u32 %s2896_s20, 1  ;;  %s2454_s27 = sshll.u32 %s169_s3, 3 }
  0x4a   : > { %s182_s6 = sadd.s32 %s3988_s29, %s4020_s5  ;;  %p3178_p7 = por %p118_p0, %p117_p9 }
  0x4b   : > { %s2458_s19 = sshll.u32 %s182_s6, 7  ;;  %s173_s0 = scalar_lea.vmem [#allocation4], %s2454_s27 }
  0x4c   : > { %s3989_s22 = scalar_select %p3178_p7, 1, 0 }
  0x4d   : > { %s3185_s28 = scalar_lea.hbm %s3959_s1, %s2458_s19  ;;  %s186_s14 = sshll.u32 %s173_s0, 4  ;;  %s3195_s14 = int_to_ptr.vmem [resolvable:$true] %s186_s14 }
  0x4e   : > { %p3990_p4 = scmp.lt.s32.totalorder %s2900_s21, 4  ;;  %s170_s24 = scalar_lea.sflag [#allocation5], %s169_s3 }
  0x4f   : > { %s2727_s16 = scalar_lea.hbm %s3185_s28, 128  ;;  %s2732_s11 = scalar_lea.hbm %s3959_s1, 512 }
  0x50   : > { %p3191_p8 = pnand %p3990_p4, %p3150_p13  ;;  %p2728_p10 = scmp.ne.s32.totalorder %s3185_s28, %s2727_s16 }
  0x51   : > { %p2733_p13 = scmp.lt.u32.totalorder %s3185_s28, %s3959_s1  ;;  %p2734_p6 = scmp.lt.u32.totalorder %s2732_s11, %s2727_s16 }
  0x52   : > { %p2729_p12 = pneg %p3191_p8  ;;  %p2736_p0 = scmp.lt.u32.totalorder %s2727_s16, %s3185_s28 }
  0x53   : > { %p2735_p9 = por %p2734_p6, %p2733_p13 }
  0x54   : > { %p2730_p1 = pnand %p2729_p12, %p2728_p10 }
  0x55   : > { %p2737_p4 = por %p2736_p0, %p2735_p9 }
  0x56   : > { %p2731_p3 = pneg %p2730_p1 }
  0x58   : > { %p2738_p7 = pnand %p2737_p4, %p2731_p3 }
  0x5a   : > { %2741 = shalt.err (!%p2738_p7)
}
  0x5b   : > { %s2742_s3 = scalar_lea.vmem %s3195_s14, 128  ;;  %s2937_s27 = smov [#allocation4]  }
  0x5c   : > { %p2743_p10 = scmp.ne.s32.totalorder %s3195_s14, %s2742_s3  ;;  %s2747_s7 = sshll.u32 %s2937_s27, 4  ;;  %s2748_s7 = int_to_ptr.vmem [resolvable:$false] %s2747_s7 }
  0x5d   : > { %s2749_s0 = scalar_lea.vmem %s2748_s7, 256  ;;  %p2750_p11 = scmp.lt.s32.totalorder %s3195_s14, %s2748_s7 }
  0x5e   : > { %p2745_p1 = pnand %p2743_p10, %p2729_p12  ;;  %p2751_p13 = scmp.lt.s32.totalorder %s2749_s0, %s2742_s3 }
  0x60   : > { %p2746_p2 = pneg %p2745_p1  ;;  %p2752_p6 = por %p2751_p13, %p2750_p11 }
  0x62   : > { %p2753_p9 = pnand %p2752_p6, %p2746_p2 }
  0x64   : > { %2756 = shalt.err (!%p2753_p9)
}
  0x65   : > { %2499 = dma.hbm_to_vmem [thread:$0]  (!%p3191_p8), %s3185_s28, 128, %s3195_s14, %s170_s24  }
  0x66   : > { %195 = sbr.rel (%p3110_p5) target bundleno = 690 (0x2b2), region = 28  ;;  %s197_s16 = sand.u32 (!%p3110_p5), 1, %s2876_s15  }
  0x67   : > { %s2460_s19 = sshll.u32 (!%p3110_p5), %s197_s16, 4  ;;  %s198_s30 = scalar_lea.sflag (!%p3110_p5), [#allocation3], %s197_s16 }
  0x68   : > { %s201_s11 = scalar_lea.vmem (!%p3110_p5), [#allocation2], %s2460_s19  ;;  %p3992_p7 = scmp.ne.s32.totalorder (!%p3110_p5), %s3981_s23, 0 }
  0x6d   : > { %2842 = dma.done.wait (%p3992_p7), %s198_s30, 256  }
  0x6e   : > { %2844 = vsyncadd (%p3992_p7), %s198_s30, 4294967040  ;;  %s206_s5 = sand.u32 1, %s2864_s12   ;;  %p3993_p11 = scmp.ne.s32.totalorder %s3986_s25, 0 }
  0x6f   : > { %s2461_s29 = sshll.u32 %s206_s5, 3  ;;  %s207_s6 = scalar_lea.sflag [#allocation5], %s206_s5 }
  0x70   : > { %s210_s28 = scalar_lea.vmem [#allocation4], %s2461_s29 }
  0x71   : > { %2846 = dma.done.wait (%p3993_p11), %s207_s6, 128  }
  0x72   : > { %2848 = vsyncadd (%p3993_p11), %s207_s6, 4294967168  ;;  %v260_v0 = vlaneseq  ;;  %s2463_s4 = sshll.u32 %s2884_s17, 4  ;;  %v248_v5 = vld [vmem:[%s210_s28 + $0x7] sm:$0x1]  ;;  %vm253_vm2 = vcmask 1040384   ;;  %s2938_s25 = smov 120  }
  0x73   : > { %s2464_s14 = sadd.s32 4294967295, %s2463_s4  ;;  %v249_v6 = vld [vmem:[%s201_s11] sm:$0xff]  ;;  %v250_v9 = vld [vmem:[%s201_s11 + $0x8] sm:$0x7f]  ;;  %s2939_s23 = smov 124   ;;  %vm916_vm7 = vcmask 31744  }
  0x74   : > { %v3235_v1 = vshrl.u32 %v260_v0, 7  ;;  %v265_v2 = vstv %s2464_s14  ;;  %v254_v8 = vrot.slane %v249_v6, 7  ;;  %v255_v10 = vrot.slane %v250_v9, 7  ;;  %s2940_s24 = smov 116   ;;  %s2941_s3 = smov 112  }
  0x75   : > { %s2942_s27 = smov 108   ;;  %s2943_s7 = smov 104   ;;  %v2953_v21 = vmov 1983009808   ;;  %v2954_v26 = vmov 1934713408  }
  0x76   : > { %v266_v3 = vadd.s32 %v265_v2, %v3235_v1  ;;  %v262_v4 = vadd.s32 8, %v3235_v1  ;;  %v259_v11 = vsel %vm253_vm2, %v248_v5, %v254_v8  ;;  %v256_v13 = vsel %vm253_vm2, %v254_v8, %v255_v10  ;;  %s2944_s0 = smov 100   ;;  %s2945_s16 = smov 96  }
  0x77   : > { %s2946_s19 = smov 92   ;;  %s2947_s30 = smov 88   ;;  %v375_v22 = vunpack.c.l.s4 %v2953_v21  ;;  %v439_v27 = vunpack.c.l.s4 %v2954_v26  ;;  %vm1613_vm8 = vcmask 64512   ;;  %vm1616_vm9 = vcmask 130048  }
  0x78   : > { %vm268_vm0 = vcmp.ge.s32.totalorder %v266_v3, 0  ;;  %vm270_vm1 = vcmp.lt.s32.totalorder %v266_v3, 16  ;;  %v267_v7 = vadd.s32 %v265_v2, %v262_v4  ;;  %s2948_s11 = smov 84   ;;  %s2949_s5 = smov 80   ;;  %vm1619_vm10 = vcmask 195584  }
  0x79   : > { %vm272_vm3 = vmand %vm268_vm0, %vm270_vm1  ;;  %s2950_s29 = smov 76   ;;  %s2951_s6 = smov 72   ;;  %v376_v25 = vunpack.c.0.s8 %v375_v22  ;;  %v440_v34 = vunpack.c.0.s8 %v439_v27  ;;  %vm1622_vm11 = vcmask 261120   ;;  %vm1625_vm12 = vcmask 326656  }
  0x7a   : > { %vm269_vm4 = vcmp.ge.s32.totalorder %v267_v7, 0  ;;  %vm271_vm5 = vcmp.lt.s32.totalorder %v267_v7, 16  ;;  %v3240_v12 = vsel %vm272_vm3, %v259_v11, 0.0  ;;  %s2952_s28 = smov 68   ;;  %s2955_s4 = smov 8   ;;  %vm1628_vm13 = vcmask 392192  }
  0x7b   : > { %vm273_vm6 = vmand %vm269_vm4, %vm271_vm5  ;;  %288 = vrot.lane.b32.xlu1 %v3240_v12, %s2938_s25  ;;  %282 = vrot.lane.b32.xlu0 %v3240_v12, %s2939_s23  ;;  %v3290_v33 = vsub.s32 %v376_v25, %v3235_v1  ;;  %v3302_v45 = vsub.s32 %v440_v34, %v3235_v1  ;;  %s2956_s14 = smov 16   ;;  %vm1631_vm14 = vcmask 457728   ;;  %vm1634_vm15 = vcmask 523264   ;;  %p3994_p5 = scmp.ne.s32.totalorder %s3989_s22, 0 }
  0x7c   : > { %v3246_v14 = vsel %vm273_vm6, %v256_v13, 0.0  ;;  %vm1637_vm0 = vcmask 588800   ;;  %vm1640_vm1 = vcmask 654336   ;;  %vm1643_vm3 = vcmask 719872  }
  0x7d   : > { %vm1646_vm4 = vcmask 785408   ;;  %vm1649_vm5 = vcmask 850944   ;;  %vm1652_vm6 = vcmask 916480  }
  0x7f   : > { %290 = vrot.lane.b32.xlu1 %v3246_v14, %s2938_s25  ;;  %284 = vrot.lane.b32.xlu0 %v3246_v14, %s2939_s23  ;;  %s2957_s23 = smov 24  }
  0x83   : > { %296 = vrot.lane.b32.xlu1 %v3246_v14, %s2940_s24  ;;  %294 = vrot.lane.b32.xlu0 %v3240_v12, %s2940_s24  ;;  %s2958_s24 = smov 32  }
  0x87   : > { %302 = vrot.lane.b32.xlu1 %v3246_v14, %s2941_s3  ;;  %300 = vrot.lane.b32.xlu0 %v3240_v12, %s2941_s3 }
  0x8b   : > { %308 = vrot.lane.b32.xlu1 %v3246_v14, %s2942_s27  ;;  %306 = vrot.lane.b32.xlu0 %v3240_v12, %s2942_s27  ;;  %s2959_s27 = smov 40  }
  0x8f   : > { %314 = vrot.lane.b32.xlu1 %v3246_v14, %s2943_s7  ;;  %312 = vrot.lane.b32.xlu0 %v3240_v12, %s2943_s7 }
  0x93   : > { %320 = vrot.lane.b32.xlu1 %v3246_v14, %s2944_s0  ;;  %318 = vrot.lane.b32.xlu0 %v3240_v12, %s2944_s0  ;;  %s2960_s0 = smov 48  }
  0x97   : > { %326 = vrot.lane.b32.xlu1 %v3246_v14, %s2945_s16  ;;  %324 = vrot.lane.b32.xlu0 %v3240_v12, %s2945_s16 }
  0x9b   : > { %332 = vrot.lane.b32.xlu1 %v3246_v14, %s2946_s19  ;;  %330 = vrot.lane.b32.xlu0 %v3240_v12, %s2946_s19  ;;  %s2961_s19 = smov 56  }
  0x9f   : > { %338 = vrot.lane.b32.xlu1 %v3246_v14, %s2947_s30  ;;  %336 = vrot.lane.b32.xlu0 %v3240_v12, %s2947_s30 }
  0xa3   : > { %344 = vrot.lane.b32.xlu1 %v3246_v14, %s2948_s11  ;;  %342 = vrot.lane.b32.xlu0 %v3240_v12, %s2948_s11  ;;  %s2962_s11 = smov 64  }
  0xa7   : > { %350 = vrot.lane.b32.xlu1 %v3246_v14, %s2949_s5  ;;  %348 = vrot.lane.b32.xlu0 %v3240_v12, %s2949_s5 }
  0xab   : > { %356 = vrot.lane.b32.xlu1 %v3246_v14, %s2950_s29  ;;  %354 = vrot.lane.b32.xlu0 %v3240_v12, %s2950_s29 }
  0xaf   : > { %362 = vrot.lane.b32.xlu1 %v3246_v14, %s2951_s6  ;;  %360 = vrot.lane.b32.xlu0 %v3240_v12, %s2951_s6 }
  0xb3   : > { %368 = vrot.lane.b32.xlu1 %v3246_v14, %s2952_s28  ;;  %366 = vrot.lane.b32.xlu0 %v3240_v12, %s2952_s28 }
  0xed   : > { %v289_v15 = vpop.permute.xlu1 %288  ;;  %v283_v16 = vpop.permute.xlu0 %282 }
  0xee   : > { %v372_v37 = vcombine.low %v3240_v12, %v289_v15  ;;  %v373_v39 = vcombine.high %v3240_v12, %v289_v15 }
  0xf0   : > { %v380_v48 = vrot.slane %v372_v37, %v3290_v33  ;;  %v387_v52 = vrot.slane %v373_v39, %v3290_v33 }
  0xf1   : > { %v291_v17 = vpop.permute.xlu1 %290  ;;  %v285_v18 = vpop.permute.xlu0 %284 }
  0xf2   : > { %v644_v35 = vcombine.low %v3246_v14, %v291_v17  ;;  %v645_v36 = vcombine.high %v3246_v14, %v291_v17 }
  0xf4   : > { %v652_v46 = vrot.slane %v644_v35, %v3290_v33  ;;  %v659_v47 = vrot.slane %v645_v36, %v3290_v33 }
  0xf5   : > { %v297_v19 = vpop.permute.xlu1 %296  ;;  %v295_v20 = vpop.permute.xlu0 %294 }
  0xf6   : > { %v660_v28 = vcombine.low %v285_v18, %v297_v19  ;;  %v661_v29 = vcombine.high %v285_v18, %v297_v19  ;;  %v388_v30 = vcombine.low %v283_v16, %v295_v20  ;;  %v389_v38 = vcombine.high %v283_v16, %v295_v20 }
  0xf8   : > { %v668_v40 = vrot.slane %v660_v28, %v3290_v33  ;;  %v675_v41 = vrot.slane %v661_v29, %v3290_v33  ;;  %v3299_v42 = vrot.slane %v388_v30, %v3290_v33  ;;  %v3308_v49 = vrot.slane %v389_v38, %v3290_v33 }
  0xf9   : > { %v303_v23 = vpop.permute.xlu1 %302  ;;  %v301_v24 = vpop.permute.xlu0 %300 }
  0xfa   : > { %v708_v53 = vcombine.low %v652_v46, %v668_v40  ;;  %v709_v54 = vcombine.high %v652_v46, %v668_v40  ;;  %v724_v55 = vcombine.low %v659_v47, %v675_v41  ;;  %v725_v56 = vcombine.high %v659_v47, %v675_v41 }
  0xfb   : > { %v436_v57 = vcombine.low %v380_v48, %v3299_v42  ;;  %v437_v3 = vcombine.high %v380_v48, %v3299_v42  ;;  %v452_v4 = vcombine.low %v387_v52, %v3308_v49  ;;  %v453_v12 = vcombine.high %v387_v52, %v3308_v49 }
  0xfc   : > { %v716_v11 = vrot.slane %v708_v53, %v3302_v45  ;;  %v723_v21 = vrot.slane %v709_v54, %v3302_v45  ;;  %v732_v29 = vrot.slane %v724_v55, %v3302_v45  ;;  %v739_v30 = vrot.slane %v725_v56, %v3302_v45 }
  0xfd   : > { %v309_v31 = vpop.permute.xlu1 %308  ;;  %v307_v32 = vpop.permute.xlu0 %306  ;;  %v460_v49 = vrot.slane %v452_v4, %v3302_v45 }
 0x101   : > { %v315_v43 = vpop.permute.xlu1 %314  ;;  %v313_v44 = vpop.permute.xlu0 %312 }
 0x102   : > { %v676_v50 = vcombine.low %v303_v23, %v315_v43  ;;  %v677_v51 = vcombine.high %v303_v23, %v315_v43  ;;  %v404_v58 = vcombine.low %v301_v24, %v313_v44  ;;  %v405_v59 = vcombine.high %v301_v24, %v313_v44 }
 0x103   : > { %v451_v44 = vrot.slane %v437_v3, %v3302_v45 }
 0x104   : > { %v684_v5 = vrot.slane %v676_v50, %v3290_v33  ;;  %v691_v6 = vrot.slane %v677_v51, %v3290_v33  ;;  %v412_v13 = vrot.slane %v404_v58, %v3290_v33  ;;  %v419_v14 = vrot.slane %v405_v59, %v3290_v33 }
 0x105   : > { %v321_v60 = vpop.permute.xlu1 %320  ;;  %v319_v61 = vpop.permute.xlu0 %318  ;;  %v467_v50 = vrot.slane %v453_v12, %v3302_v45 }
 0x106   : > { %v692_v62 = vcombine.low %v309_v31, %v321_v60  ;;  %v693_v63 = vcombine.high %v309_v31, %v321_v60  ;;  %v420_v0 = vcombine.low %v307_v32, %v319_v61  ;;  %v421_v2 = vcombine.high %v307_v32, %v319_v61 }
 0x107   : > { %v444_v31 = vrot.slane %v436_v57, %v3302_v45 }
 0x108   : > { %v700_v7 = vrot.slane %v692_v62, %v3290_v33  ;;  %v707_v8 = vrot.slane %v693_v63, %v3290_v33  ;;  %v428_v9 = vrot.slane %v420_v0, %v3290_v33  ;;  %v435_v10 = vrot.slane %v421_v2, %v3290_v33 }
 0x109   : > { %v3324_v15 = vpop.permute.xlu1 %326  ;;  %v3326_v16 = vpop.permute.xlu0 %324 }
 0x10a   : > { %v740_v17 = vcombine.low %v684_v5, %v700_v7  ;;  %v741_v18 = vcombine.high %v684_v5, %v700_v7  ;;  %v756_v19 = vcombine.low %v691_v6, %v707_v8  ;;  %v757_v20 = vcombine.high %v691_v6, %v707_v8 }
 0x10b   : > { %v468_v22 = vcombine.low %v412_v13, %v428_v9  ;;  %v469_v23 = vcombine.high %v412_v13, %v428_v9  ;;  %v484_v24 = vcombine.low %v419_v14, %v435_v10  ;;  %v485_v32 = vcombine.high %v419_v14, %v435_v10 }
 0x10c   : > { %v748_v25 = vrot.slane %v740_v17, %v3302_v45  ;;  %v755_v26 = vrot.slane %v741_v18, %v3302_v45  ;;  %v764_v27 = vrot.slane %v756_v19, %v3302_v45  ;;  %v771_v28 = vrot.slane %v757_v20, %v3302_v45 }
 0x10d   : > { %v333_v34 = vpop.permute.xlu1 %332  ;;  %v331_v35 = vpop.permute.xlu0 %330  ;;  %v476_v39 = vrot.slane %v468_v22, %v3302_v45  ;;  %v483_v47 = vrot.slane %v469_v23, %v3302_v45  ;;  %v492_v48 = vrot.slane %v484_v24, %v3302_v45  ;;  %v499_v52 = vrot.slane %v485_v32, %v3302_v45 }
 0x10e   : > { %v772_v36 = vcombine.low %v716_v11, %v748_v25  ;;  %v773_v37 = vcombine.high %v716_v11, %v748_v25  ;;  %v774_v38 = vcombine.low %v723_v21, %v755_v26  ;;  %v775_v40 = vcombine.high %v723_v21, %v755_v26 }
 0x10f   : > { %v776_v41 = vcombine.low %v732_v29, %v764_v27  ;;  %v777_v42 = vcombine.high %v732_v29, %v764_v27  ;;  %v778_v43 = vcombine.low %v739_v30, %v771_v28  ;;  %v779_v46 = vcombine.high %v739_v30, %v771_v28 }
 0x110   : > { %v3343_v51 = vsel %vm916_vm7, %v772_v36, 0.0  ;;  %v3347_v55 = vsel %vm916_vm7, %v773_v37, 0.0  ;;  %v3350_v56 = vsel %vm916_vm7, %v774_v38, 0.0  ;;  %v500_v57 = vcombine.low %v444_v31, %v476_v39 }
 0x111   : > { %v339_v53 = vpop.permute.xlu1 %338  ;;  %v337_v54 = vpop.permute.xlu0 %336  ;;  %v501_v58 = vcombine.high %v444_v31, %v476_v39  ;;  %v3353_v59 = vsel %vm916_vm7, %v775_v40, 0.0  ;;  %v3356_v60 = vsel %vm916_vm7, %v776_v41, 0.0  ;;  %v3359_v61 = vsel %vm916_vm7, %v777_v42, 0.0 }
 0x112   : > { %v3362_v62 = vsel %vm916_vm7, %v778_v43, 0.0  ;;  %v3365_v63 = vsel %vm916_vm7, %v779_v46, 0.0  ;;  %v502_v0 = vcombine.low %v451_v44, %v483_v47  ;;  %v503_v2 = vcombine.high %v451_v44, %v483_v47 }
 0x113   : > { %v504_v3 = vcombine.low %v460_v49, %v492_v48  ;;  %v505_v4 = vcombine.high %v460_v49, %v492_v48  ;;  %v506_v5 = vcombine.low %v467_v50, %v499_v52  ;;  %v507_v6 = vcombine.high %v467_v50, %v499_v52 }
 0x114   : > { %v3368_v7 = vsel %vm916_vm7, %v500_v57, 0.0  ;;  %v3371_v10 = vsel %vm916_vm7, %v501_v58, 0.0  ;;  %v780_v11 = vcombine.low %v3324_v15, %v339_v53  ;;  %v781_v12 = vcombine.high %v3324_v15, %v339_v53 }
 0x115   : > { %v345_v8 = vpop.permute.xlu1 %344  ;;  %v343_v9 = vpop.permute.xlu0 %342  ;;  %v508_v13 = vcombine.low %v3326_v16, %v337_v54  ;;  %v3377_v20 = vsel %vm916_vm7, %v502_v0, 0.0  ;;  %v3380_v21 = vsel %vm916_vm7, %v503_v2, 0.0  ;;  %v3383_v22 = vsel %vm916_vm7, %v504_v3, 0.0 }
 0x116   : > { %v796_v14 = vcombine.low %v333_v34, %v345_v8  ;;  %v797_v17 = vcombine.high %v333_v34, %v345_v8  ;;  %v524_v18 = vcombine.low %v331_v35, %v343_v9  ;;  %v525_v19 = vcombine.high %v331_v35, %v343_v9 }
 0x117   : > { %v509_v23 = vcombine.high %v3326_v16, %v337_v54  ;;  %v788_v24 = vrot.slane %v780_v11, %v3290_v33  ;;  %v795_v29 = vrot.slane %v781_v12, %v3290_v33  ;;  %v516_v30 = vrot.slane %v508_v13, %v3290_v33 }
 0x118   : > { %v804_v15 = vrot.slane %v796_v14, %v3290_v33  ;;  %v811_v25 = vrot.slane %v797_v17, %v3290_v33  ;;  %v532_v26 = vrot.slane %v524_v18, %v3290_v33  ;;  %v3397_v31 = vrot.slane %v525_v19, %v3290_v33 }
 0x119   : > { %v3390_v27 = vpop.permute.xlu1 %350  ;;  %v3392_v28 = vpop.permute.xlu0 %348  ;;  %v1085_v16 = vcombine.low %v3343_v51, %v3350_v56  ;;  %v1101_v34 = vcombine.low %v3347_v55, %v3353_v59  ;;  %v1117_v35 = vcombine.low %v3356_v60, %v3362_v62  ;;  %v1133_v36 = vcombine.low %v3359_v61, %v3365_v63 }
 0x11a   : > { %v844_v32 = vcombine.low %v788_v24, %v804_v15  ;;  %v3408_v37 = vsel %vm916_vm7, %v505_v4, 0.0  ;;  %v3411_v38 = vsel %vm916_vm7, %v506_v5, 0.0  ;;  %v3414_v39 = vsel %vm916_vm7, %v507_v6, 0.0 }
 0x11b   : > { %v523_v40 = vrot.slane %v509_v23, %v3290_v33  ;;  %v845_v41 = vcombine.high %v788_v24, %v804_v15  ;;  %v860_v42 = vcombine.low %v795_v29, %v811_v25  ;;  %v861_v43 = vcombine.high %v795_v29, %v811_v25 }
 0x11c   : > { %v572_v44 = vcombine.low %v516_v30, %v532_v26  ;;  %v3422_v48 = vrot.slane %v844_v32, %v3302_v45  ;;  %v573_v49 = vcombine.high %v516_v30, %v532_v26  ;;  %v1093_v53 = vrot.slane %v1085_v16, %v3290_v33 }
 0x11d   : > { %v3417_v46 = vpop.permute.xlu1 %356  ;;  %v3419_v47 = vpop.permute.xlu0 %354  ;;  %v588_v50 = vcombine.low %v523_v40, %v3397_v31  ;;  %v589_v52 = vcombine.high %v523_v40, %v3397_v31  ;;  %v1109_v54 = vrot.slane %v1101_v34, %v3290_v33  ;;  %v1125_v57 = vrot.slane %v1117_v35, %v3290_v33 }
 0x11e   : > { %v1141_v58 = vrot.slane %v1133_v36, %v3290_v33  ;;  %v949_v0 = vcombine.low %v3368_v7, %v3377_v20  ;;  %v965_v2 = vcombine.low %v3371_v10, %v3380_v21  ;;  %v981_v3 = vcombine.low %v3383_v22, %v3411_v38 }
 0x11f   : > { %v997_v4 = vcombine.low %v3408_v37, %v3414_v39  ;;  %v1149_v5 = vcombine.low %v1093_v53, %v1109_v54  ;;  %v1150_v8 = vcombine.high %v1093_v53, %v1109_v54  ;;  %v3443_v19 = vrot.slane %v845_v41, %v3302_v45 }
 0x120   : > { %v1181_v6 = vcombine.low %v1125_v57, %v1141_v58  ;;  %v1182_v9 = vcombine.high %v1125_v57, %v1141_v58  ;;  %v957_v13 = vrot.slane %v949_v0, %v3290_v33  ;;  %v973_v14 = vrot.slane %v965_v2, %v3290_v33 }
 0x121   : > { %v363_v11 = vpop.permute.xlu1 %362  ;;  %v361_v12 = vpop.permute.xlu0 %360  ;;  %v989_v17 = vrot.slane %v981_v3, %v3290_v33  ;;  %v1005_v18 = vrot.slane %v997_v4, %v3290_v33  ;;  %v3446_v23 = vrot.slane %v860_v42, %v3302_v45  ;;  %v3449_v24 = vrot.slane %v1149_v5, %v3302_v45 }
 0x122   : > { %v3452_v15 = vrot.slane %v1181_v6, %v3302_v45  ;;  %v1013_v25 = vcombine.low %v957_v13, %v973_v14  ;;  %v1014_v29 = vcombine.high %v957_v13, %v973_v14  ;;  %v3455_v31 = vrot.slane %v861_v43, %v3302_v45 }
 0x123   : > { %v1045_v26 = vcombine.low %v989_v17, %v1005_v18  ;;  %v1046_v30 = vcombine.high %v989_v17, %v1005_v18  ;;  %v1164_v32 = vrot.slane %v1150_v8, %v3302_v45  ;;  %v1196_v34 = vrot.slane %v1182_v9, %v3302_v45 }
 0x124   : > { %v1214_v16 = vcombine.high %v3449_v24, %v3452_v15  ;;  %v3462_v35 = vrot.slane %v1013_v25, %v3302_v45  ;;  %v812_v40 = vcombine.low %v3390_v27, %v363_v11  ;;  %v813_v41 = vcombine.high %v3390_v27, %v363_v11 }
 0x125   : > { %v3465_v36 = vrot.slane %v1045_v26, %v3302_v45  ;;  %v369_v42 = vpop.permute.xlu1 %368  ;;  %v3470_v43 = vrot.slane %v572_v44, %v3302_v45  ;;  %v3473_v53 = vrot.slane %v573_v49, %v3302_v45  ;;  %v1028_v54 = vrot.slane %v1014_v29, %v3302_v45  ;;  %v367_v58 = vpop.permute.xlu0 %366 }
 0x126   : > { %1497 = vrot.lane.b32.xlu1 %v1214_v16, %s2955_s4  ;;  %v1060_v57 = vrot.slane %v1046_v30, %v3302_v45  ;;  %v3479_v0 = vrot.slane %v588_v50, %v3302_v45  ;;  %v540_v44 = vcombine.low %v3392_v28, %v361_v12  ;;  %v541_v2 = vcombine.high %v3392_v28, %v361_v12 }
 0x127   : > { %v1078_v27 = vcombine.high %v3462_v35, %v3465_v36  ;;  %v3486_v49 = vrot.slane %v589_v52, %v3302_v45  ;;  %v1215_v3 = vcombine.low %v1164_v32, %v1196_v34  ;;  %v828_v4 = vcombine.low %v3417_v46, %v369_v42 }
 0x128   : > { %v829_v5 = vcombine.high %v3417_v46, %v369_v42  ;;  %v820_v50 = vrot.slane %v812_v40, %v3290_v33  ;;  %v827_v6 = vrot.slane %v813_v41, %v3290_v33  ;;  %v556_v8 = vcombine.low %v3419_v47, %v367_v58 }
 0x129   : > { %1495 = vrot.lane.b32.xlu0 %v1078_v27, %s2955_s4  ;;  %v557_v9 = vcombine.high %v3419_v47, %v367_v58  ;;  %v1079_v28 = vcombine.low %v1028_v54, %v1060_v57  ;;  %v1216_v52 = vcombine.high %v1164_v32, %v1196_v34  ;;  %v836_v11 = vrot.slane %v828_v4, %v3290_v33 }
 0x12a   : > { %1505 = vrot.lane.b32.xlu1 %v1215_v3, %s2956_s14  ;;  %v843_v12 = vrot.slane %v829_v5, %v3290_v33  ;;  %v548_v46 = vrot.slane %v540_v44, %v3290_v33  ;;  %v555_v13 = vrot.slane %v541_v2, %v3290_v33  ;;  %v564_v14 = vrot.slane %v556_v8, %v3290_v33 }
 0x12b   : > { %v571_v17 = vrot.slane %v557_v9, %v3290_v33  ;;  %v876_v18 = vcombine.low %v820_v50, %v836_v11  ;;  %v877_v25 = vcombine.high %v820_v50, %v836_v11  ;;  %v1080_v29 = vcombine.high %v1028_v54, %v1060_v57 }
 0x12c   : > { %v892_v26 = vcombine.low %v827_v6, %v843_v12  ;;  %v893_v47 = vcombine.high %v827_v6, %v843_v12  ;;  %v604_v30 = vcombine.low %v548_v46, %v564_v14  ;;  %v605_v16 = vcombine.high %v548_v46, %v564_v14 }
 0x12d   : > { %1503 = vrot.lane.b32.xlu0 %v1079_v28, %s2956_s14  ;;  %v620_v32 = vcombine.low %v555_v13, %v571_v17  ;;  %v884_v34 = vrot.slane %v876_v18, %v3302_v45  ;;  %v891_v40 = vrot.slane %v877_v25, %v3302_v45  ;;  %v621_v27 = vcombine.high %v555_v13, %v571_v17 }
 0x12e   : > { %1513 = vrot.lane.b32.xlu1 %v1216_v52, %s2957_s23  ;;  %v900_v41 = vrot.slane %v892_v26, %v3302_v45  ;;  %v907_v42 = vrot.slane %v893_v47, %v3302_v45  ;;  %v612_v58 = vrot.slane %v604_v30, %v3302_v45  ;;  %v1086_v44 = vcombine.high %v3343_v51, %v3350_v56 }
 0x12f   : > { %v1102_v54 = vcombine.high %v3347_v55, %v3353_v59  ;;  %v908_v57 = vcombine.low %v3422_v48, %v884_v34  ;;  %v909_v2 = vcombine.high %v3422_v48, %v884_v34  ;;  %v910_v3 = vcombine.low %v3443_v19, %v891_v40 }
 0x130   : > { %v911_v4 = vcombine.high %v3443_v19, %v891_v40  ;;  %v912_v5 = vcombine.low %v3446_v23, %v900_v41  ;;  %v913_v50 = vcombine.high %v3446_v23, %v900_v41  ;;  %v914_v6 = vcombine.low %v3455_v31, %v907_v42 }
 0x131   : > { %1511 = vrot.lane.b32.xlu0 %v1080_v29, %s2957_s23  ;;  %v1118_v51 = vcombine.high %v3356_v60, %v3362_v62  ;;  %v915_v55 = vcombine.high %v3455_v31, %v907_v42  ;;  %v619_v56 = vrot.slane %v605_v16, %v3302_v45  ;;  %v628_v59 = vrot.slane %v620_v32, %v3302_v45 }
 0x132   : > { %v1134_v48 = vcombine.high %v3359_v61, %v3365_v63  ;;  %v3525_v19 = vsel %vm916_vm7, %v908_v57, 0.0  ;;  %v635_v8 = vrot.slane %v621_v27, %v3302_v45  ;;  %v1100_v23 = vrot.slane %v1086_v44, %v3290_v33 }
 0x133   : > { %v1116_v9 = vrot.slane %v1102_v54, %v3290_v33  ;;  %v3531_v60 = vsel %vm916_vm7, %v909_v2, 0.0  ;;  %v3534_v62 = vsel %vm916_vm7, %v910_v3, 0.0  ;;  %v3537_v31 = vsel %vm916_vm7, %v911_v4, 0.0 }
 0x134   : > { %v636_v61 = vcombine.low %v3470_v43, %v612_v58  ;;  %v3541_v63 = vsel %vm916_vm7, %v912_v5, 0.0  ;;  %v3544_v28 = vsel %vm916_vm7, %v913_v50, 0.0  ;;  %v3547_v52 = vsel %vm916_vm7, %v914_v6, 0.0 }
 0x135   : > { %v637_v11 = vcombine.high %v3470_v43, %v612_v58  ;;  %v3551_v12 = vsel %vm916_vm7, %v915_v55, 0.0  ;;  %v638_v46 = vcombine.low %v3473_v53, %v619_v56  ;;  %v639_v13 = vcombine.high %v3473_v53, %v619_v56 }
 0x136   : > { %v640_v14 = vcombine.low %v3479_v0, %v628_v59  ;;  %v641_v17 = vcombine.high %v3479_v0, %v628_v59  ;;  %v642_v18 = vcombine.low %v3486_v49, %v635_v8  ;;  %v643_v25 = vcombine.high %v3486_v49, %v635_v8 }
 0x137   : > { %v3560_v26 = vsel %vm916_vm7, %v636_v61, 0.0  ;;  %v1132_v43 = vrot.slane %v1118_v51, %v3290_v33  ;;  %v1148_v47 = vrot.slane %v1134_v48, %v3290_v33  ;;  %v1165_v29 = vcombine.low %v1100_v23, %v1116_v9 }
 0x138   : > { %v950_v30 = vcombine.high %v3368_v7, %v3377_v20  ;;  %v3567_v53 = vsel %vm916_vm7, %v637_v11, 0.0  ;;  %v966_v0 = vcombine.high %v3371_v10, %v3380_v21  ;;  %v982_v49 = vcombine.high %v3383_v22, %v3411_v38 }
 0x139   : > { %v998_v16 = vcombine.high %v3408_v37, %v3414_v39  ;;  %v3576_v32 = vsel %vm916_vm7, %v638_v46, 0.0  ;;  %v1173_v34 = vrot.slane %v1165_v29, %v3302_v45  ;;  %v1197_v40 = vcombine.low %v1132_v43, %v1148_v47 }
 0x13a   : > { %v964_v7 = vrot.slane %v950_v30, %v3290_v33  ;;  %v3581_v20 = vsel %vm916_vm7, %v639_v13, 0.0  ;;  %v980_v41 = vrot.slane %v966_v0, %v3290_v33  ;;  %v996_v10 = vrot.slane %v982_v49, %v3290_v33 }
 0x13b   : > { %v1012_v21 = vrot.slane %v998_v16, %v3290_v33  ;;  %v3587_v22 = vsel %vm916_vm7, %v640_v14, 0.0  ;;  %v1205_v37 = vrot.slane %v1197_v40, %v3302_v45  ;;  %v1357_v38 = vcombine.low %v3525_v19, %v3534_v62 }
 0x13c   : > { %v1373_v39 = vcombine.low %v3531_v60, %v3537_v31  ;;  %v1029_v42 = vcombine.low %v964_v7, %v980_v41  ;;  %v1166_v27 = vcombine.high %v1100_v23, %v1116_v9  ;;  %v1198_v44 = vcombine.high %v1132_v43, %v1148_v47 }
 0x13d   : > { %v1061_v58 = vcombine.low %v996_v10, %v1012_v21  ;;  %v3595_v54 = vsel %vm916_vm7, %v641_v17, 0.0  ;;  %v3598_v57 = vsel %vm916_vm7, %v642_v18, 0.0  ;;  %v3601_v2 = vsel %vm916_vm7, %v643_v25, 0.0 }
 0x13e   : > { %v1217_v3 = vcombine.low %v1173_v34, %v1205_v37  ;;  %v1037_v4 = vrot.slane %v1029_v42, %v3302_v45  ;;  %v1030_v50 = vcombine.high %v964_v7, %v980_v41  ;;  %v1062_v6 = vcombine.high %v996_v10, %v1012_v21 }
 0x13f   : > { %v1069_v5 = vrot.slane %v1061_v58, %v3302_v45  ;;  %v1365_v51 = vrot.slane %v1357_v38, %v3290_v33  ;;  %v1381_v55 = vrot.slane %v1373_v39, %v3290_v33  ;;  %v1389_v56 = vcombine.low %v3541_v63, %v3547_v52 }
 0x140   : > { %1521 = vrot.lane.b32.xlu1 %v1217_v3, %s2958_s24  ;;  %v1405_v59 = vcombine.low %v3544_v28, %v3551_v12  ;;  %v1180_v8 = vrot.slane %v1166_v27, %v3302_v45  ;;  %v1212_v23 = vrot.slane %v1198_v44, %v3302_v45  ;;  %v1218_v9 = vcombine.high %v1173_v34, %v1205_v37 }
 0x141   : > { %v1081_v48 = vcombine.low %v1037_v4, %v1069_v5  ;;  %v1397_v61 = vrot.slane %v1389_v56, %v3290_v33  ;;  %v1221_v46 = vcombine.low %v3560_v26, %v3576_v32  ;;  %v1044_v13 = vrot.slane %v1030_v50, %v3302_v45 }
 0x142   : > { %v1413_v11 = vrot.slane %v1405_v59, %v3290_v33  ;;  %v1237_v14 = vcombine.low %v3567_v53, %v3581_v20  ;;  %v1253_v17 = vcombine.low %v3587_v22, %v3598_v57  ;;  %v1269_v18 = vcombine.low %v3595_v54, %v3601_v2 }
 0x143   : > { %1519 = vrot.lane.b32.xlu0 %v1081_v48, %s2958_s24  ;;  %v1076_v25 = vrot.slane %v1062_v6, %v3302_v45  ;;  %v1421_v43 = vcombine.low %v1365_v51, %v1381_v55  ;;  %v1229_v29 = vrot.slane %v1221_v46, %v3290_v33  ;;  %v1082_v30 = vcombine.high %v1037_v4, %v1069_v5 }
 0x144   : > { %1529 = vrot.lane.b32.xlu1 %v1218_v9, %s2959_s27  ;;  %v1453_v47 = vcombine.low %v1397_v61, %v1413_v11  ;;  %v1245_v0 = vrot.slane %v1237_v14, %v3290_v33  ;;  %v1261_v49 = vrot.slane %v1253_v17, %v3290_v33  ;;  %v1277_v16 = vrot.slane %v1269_v18, %v3290_v33 }
 0x145   : > { %v1219_v34 = vcombine.low %v1180_v8, %v1212_v23  ;;  %v1429_v41 = vrot.slane %v1421_v43, %v3302_v45  ;;  %v1083_v21 = vcombine.low %v1044_v13, %v1076_v25  ;;  %v1220_v37 = vcombine.high %v1180_v8, %v1212_v23 }
 0x146   : > { %v1285_v40 = vcombine.low %v1229_v29, %v1245_v0  ;;  %v1317_v7 = vcombine.low %v1261_v49, %v1277_v16  ;;  %v1461_v10 = vrot.slane %v1453_v47, %v3302_v45  ;;  %v1422_v42 = vcombine.high %v1365_v51, %v1381_v55 }
 0x147   : > { %1527 = vrot.lane.b32.xlu0 %v1082_v30, %s2959_s27  ;;  %v1454_v58 = vcombine.high %v1397_v61, %v1413_v11  ;;  %v1084_v44 = vcombine.high %v1044_v13, %v1076_v25  ;;  %v1358_v3 = vcombine.high %v3525_v19, %v3534_v62  ;;  %v1374_v4 = vcombine.high %v3531_v60, %v3537_v31 }
 0x148   : > { %1537 = vrot.lane.b32.xlu1 %v1219_v34, %s2960_s0  ;;  %v1293_v38 = vrot.slane %v1285_v40, %v3302_v45  ;;  %v1325_v39 = vrot.slane %v1317_v7, %v3302_v45  ;;  %v1485_v27 = vcombine.low %v1429_v41, %v1461_v10  ;;  %v1390_v5 = vcombine.high %v3541_v63, %v3547_v52 }
 0x149   : > { %v1406_v50 = vcombine.high %v3544_v28, %v3551_v12  ;;  %v1436_v51 = vrot.slane %v1422_v42, %v3302_v45  ;;  %v1468_v55 = vrot.slane %v1454_v58, %v3302_v45  ;;  %v1286_v56 = vcombine.high %v1229_v29, %v1245_v0 }
 0x14a   : > { %v1349_v6 = vcombine.low %v1293_v38, %v1325_v39  ;;  %v1486_v59 = vcombine.high %v1429_v41, %v1461_v10  ;;  %v1318_v19 = vcombine.high %v1261_v49, %v1277_v16  ;;  %v1213_v60 = vcombine.low %v3449_v24, %v3452_v15 }
 0x14b   : > { %1535 = vrot.lane.b32.xlu0 %v1083_v21, %s2960_s0  ;;  %v1077_v62 = vcombine.low %v3462_v35, %v3465_v36  ;;  %v1222_v31 = vcombine.high %v3560_v26, %v3576_v32  ;;  %v1238_v63 = vcombine.high %v3567_v53, %v3581_v20  ;;  %v1254_v28 = vcombine.high %v3587_v22, %v3598_v57 }
 0x14c   : > { %1545 = vrot.lane.b32.xlu1 %v1220_v37, %s2961_s19  ;;  %v1270_v52 = vcombine.high %v3595_v54, %v3601_v2  ;;  %v1372_v12 = vrot.slane %v1358_v3, %v3290_v33  ;;  %v1388_v48 = vrot.slane %v1374_v4, %v3290_v33  ;;  %v1404_v8 = vrot.slane %v1390_v5, %v3290_v33 }
 0x14d   : > { %v1420_v23 = vrot.slane %v1406_v50, %v3290_v33  ;;  %v1350_v26 = vcombine.high %v1293_v38, %v1325_v39  ;;  %v1300_v53 = vrot.slane %v1286_v56, %v3302_v45  ;;  %v1332_v32 = vrot.slane %v1318_v19, %v3302_v45 }
 0x14e   : > { %v1236_v20 = vrot.slane %v1222_v31, %v3290_v33  ;;  %v1252_v22 = vrot.slane %v1238_v63, %v3290_v33  ;;  %v1268_v54 = vrot.slane %v1254_v28, %v3290_v33  ;;  %v1284_v57 = vrot.slane %v1270_v52, %v3290_v33 }
 0x14f   : > { %1543 = vrot.lane.b32.xlu0 %v1084_v44, %s2961_s19  ;;  %v1487_v2 = vcombine.low %v1436_v51, %v1468_v55  ;;  %v1437_v9 = vcombine.low %v1372_v12, %v1388_v48  ;;  %v1469_v61 = vcombine.low %v1404_v8, %v1420_v23  ;;  %v1351_v11 = vcombine.low %v1300_v53, %v1332_v32 }
 0x150   : > { %1553 = vrot.lane.b32.xlu1 %v1485_v27, %s2962_s11  ;;  %v1301_v46 = vcombine.low %v1236_v20, %v1252_v22  ;;  %v1333_v13 = vcombine.low %v1268_v54, %v1284_v57  ;;  %v1488_v14 = vcombine.high %v1436_v51, %v1468_v55  ;;  %v1352_v25 = vcombine.high %v1300_v53, %v1332_v32 }
 0x151   : > { %v1445_v17 = vrot.slane %v1437_v9, %v3302_v45  ;;  %v1477_v18 = vrot.slane %v1469_v61, %v3302_v45  ;;  %v1438_v30 = vcombine.high %v1372_v12, %v1388_v48  ;;  %v1470_v0 = vcombine.high %v1404_v8, %v1420_v23 }
 0x152   : > { %v1309_v43 = vrot.slane %v1301_v46, %v3302_v45  ;;  %v1341_v47 = vrot.slane %v1333_v13, %v3302_v45  ;;  %v1302_v16 = vcombine.high %v1236_v20, %v1252_v22  ;;  %v1334_v34 = vcombine.high %v1268_v54, %v1284_v57 }
 0x153   : > { %1551 = vrot.lane.b32.xlu0 %v1349_v6, %s2962_s11  ;;  %v1489_v29 = vcombine.low %v1445_v17, %v1477_v18  ;;  %v1490_v40 = vcombine.high %v1445_v17, %v1477_v18  ;;  %v1452_v7 = vrot.slane %v1438_v30, %v3302_v45  ;;  %v1484_v41 = vrot.slane %v1470_v0, %v3302_v45 }
 0x154   : > { %1561 = vrot.lane.b32.xlu1 %v1486_v59, %s2951_s6  ;;  %v1353_v49 = vcombine.low %v1309_v43, %v1341_v47  ;;  %v1354_v10 = vcombine.high %v1309_v43, %v1341_v47  ;;  %v1316_v21 = vrot.slane %v1302_v16, %v3302_v45  ;;  %v1348_v37 = vrot.slane %v1334_v34, %v3302_v45 }
 0x155   : > { %v1491_v38 = vcombine.low %v1452_v7, %v1484_v41  ;;  %v1492_v42 = vcombine.high %v1452_v7, %v1484_v41  ;;  %vm1655_vm7 = vcmask 982016  }
 0x156   : > { %v1355_v39 = vcombine.low %v1316_v21, %v1348_v37  ;;  %v1356_v58 = vcombine.high %v1316_v21, %v1348_v37 }
 0x157   : > { %1559 = vrot.lane.b32.xlu0 %v1350_v26, %s2951_s6 }
 0x158   : > { %1569 = vrot.lane.b32.xlu1 %v1487_v2, %s2949_s5 }
 0x15b   : > { %1567 = vrot.lane.b32.xlu0 %v1351_v11, %s2949_s5  ;;  %s2488_s5 = smul.u32 (%p3994_p5), 10, %s2888_s18 }
 0x15c   : > { %1577 = vrot.lane.b32.xlu1 %v1488_v14, %s2947_s30 }
 0x15f   : > { %1575 = vrot.lane.b32.xlu0 %v1352_v25, %s2947_s30 }
 0x160   : > { %1585 = vrot.lane.b32.xlu1 %v1489_v29, %s2945_s16 }
 0x163   : > { %1583 = vrot.lane.b32.xlu0 %v1353_v49, %s2945_s16  ;;  %s2485_s16 = sshll.u32 (%p3994_p5), %s2884_s17, 3 }
 0x164   : > { %1593 = vrot.lane.b32.xlu1 %v1490_v40, %s2943_s7  ;;  %s2231_s29 = sadd.s32 (%p3994_p5), %s2488_s5, %s2485_s16 }
 0x165   : > { %s2471_s6 = sshll.u32 (%p3994_p5), %s2231_s29, 3 }
 0x166   : > { %s3868_s23 = scalar_lea.vmem (%p3994_p5), %s3960_s2, %s2471_s6  }
 0x167   : > { %1591 = vrot.lane.b32.xlu0 %v1354_v10, %s2943_s7  ;;  %s2466_s7 = sshll.u32 (%p3994_p5), %s2884_s17, 2 }
 0x168   : > { %1601 = vrot.lane.b32.xlu1 %v1491_v38, %s2941_s3  ;;  %s2223_s30 = ssub.s32 (%p3994_p5), 5, %s2466_s7 }
 0x169   : > { %p2224_p2 = scmp.lt.s32.totalorder (%p3994_p5), %s2223_s30, 4 }
 0x16b   : > { %1599 = vrot.lane.b32.xlu0 %v1355_v39, %s2941_s3 }
 0x16c   : > { %1609 = vrot.lane.b32.xlu1 %v1492_v42, %s2938_s25  ;;  %v2963_v42 = vmov 1966171168  }
 0x16f   : > { %1607 = vrot.lane.b32.xlu0 %v1356_v58, %s2938_s25  ;;  %v1677_v58 = vunpack.c.l.s4 %v2963_v42  ;;  %s232_s25 = sand.u32 1, %s2852_s9  }
 0x170   : > { %s2462_s9 = sshll.u32 %s232_s25, 6 }
 0x171   : > { %s3803_s3 = scalar_lea.vmem [#allocation6], %s2462_s9  }
 0x198   : > { %v1498_v27 = vpop.permute.xlu1 %1497 }
 0x199   : > { %v1615_v26 = vsel %vm1613_vm8, %v1213_v60, %v1498_v27  ;;  %v1678_v27 = vunpack.c.0.s8 %v1677_v58 }
 0x19b   : > { %v1496_v44 = vpop.permute.xlu0 %1495 }
 0x19c   : > { %v1506_v3 = vpop.permute.xlu1 %1505  ;;  %v1614_v54 = vsel %vm1613_vm8, %v1077_v62, %v1496_v44  ;;  %v3720_v44 = vsub.s32 %v1678_v27, %v3235_v1 }
 0x19d   : > { %v1618_v32 = vsel %vm1616_vm9, %v1615_v26, %v1506_v3 }
 0x19f   : > { %v1504_v4 = vpop.permute.xlu0 %1503 }
 0x1a0   : > { %v1514_v5 = vpop.permute.xlu1 %1513  ;;  %v1617_v2 = vsel %vm1616_vm9, %v1614_v54, %v1504_v4 }
 0x1a1   : > { %v1621_v22 = vsel %vm1619_vm10, %v1618_v32, %v1514_v5 }
 0x1a3   : > { %v1512_v45 = vpop.permute.xlu0 %1511 }
 0x1a4   : > { %v1620_v60 = vsel %vm1619_vm10, %v1617_v2, %v1512_v45 }
 0x1b2   : > { %v1522_v50 = vpop.permute.xlu1 %1521 }
 0x1b3   : > { %v1624_v57 = vsel %vm1622_vm11, %v1621_v22, %v1522_v50 }
 0x1b5   : > { %v1520_v6 = vpop.permute.xlu0 %1519 }
 0x1b6   : > { %v1530_v51 = vpop.permute.xlu1 %1529  ;;  %v1623_v11 = vsel %vm1622_vm11, %v1620_v60, %v1520_v6 }
 0x1b7   : > { %v1627_v24 = vsel %vm1625_vm12, %v1624_v57, %v1530_v51 }
 0x1b9   : > { %v1528_v55 = vpop.permute.xlu0 %1527 }
 0x1ba   : > { %v1538_v56 = vpop.permute.xlu1 %1537  ;;  %v1626_v36 = vsel %vm1625_vm12, %v1623_v11, %v1528_v55 }
 0x1bb   : > { %v1630_v9 = vsel %vm1628_vm13, %v1627_v24, %v1538_v56 }
 0x1bd   : > { %v1536_v59 = vpop.permute.xlu0 %1535 }
 0x1be   : > { %v1546_v19 = vpop.permute.xlu1 %1545  ;;  %v1629_v46 = vsel %vm1628_vm13, %v1626_v36, %v1536_v59 }
 0x1bf   : > { %v1633_v35 = vsel %vm1631_vm14, %v1630_v9, %v1546_v19  ;;  %v3729_v19 = vsub.s32 0, %v3235_v1 }
 0x1c1   : > { %v1544_v31 = vpop.permute.xlu0 %1543 }
 0x1c2   : > { %v1554_v63 = vpop.permute.xlu1 %1553  ;;  %v1632_v17 = vsel %vm1631_vm14, %v1629_v46, %v1544_v31  ;;  %v3732_v31 = vsub.s32 1, %v3235_v1 }
 0x1c3   : > { %v1636_v62 = vsel %vm1634_vm15, %v1633_v35, %v1554_v63 }
 0x1c5   : > { %v1552_v28 = vpop.permute.xlu0 %1551 }
 0x1c6   : > { %v1562_v52 = vpop.permute.xlu1 %1561  ;;  %v1635_v43 = vsel %vm1634_vm15, %v1632_v17, %v1552_v28 }
 0x1c7   : > { %v1639_v13 = vsel %vm1637_vm0, %v1636_v62, %v1562_v52 }
 0x1c9   : > { %v1560_v12 = vpop.permute.xlu0 %1559 }
 0x1ca   : > { %v1570_v48 = vpop.permute.xlu1 %1569  ;;  %v1638_v29 = vsel %vm1637_vm0, %v1635_v43, %v1560_v12 }
 0x1cb   : > { %v1642_v18 = vsel %vm1640_vm1, %v1639_v13, %v1570_v48 }
 0x1cd   : > { %v1568_v8 = vpop.permute.xlu0 %1567 }
 0x1ce   : > { %v1578_v23 = vpop.permute.xlu1 %1577  ;;  %v1641_v0 = vsel %vm1640_vm1, %v1638_v29, %v1568_v8 }
 0x1cf   : > { %v1645_v47 = vsel %vm1643_vm3, %v1642_v18, %v1578_v23 }
 0x1d1   : > { %v1576_v53 = vpop.permute.xlu0 %1575 }
 0x1d2   : > { %v1586_v20 = vpop.permute.xlu1 %1585  ;;  %v1644_v34 = vsel %vm1643_vm3, %v1641_v0, %v1576_v53 }
 0x1d3   : > { %v1648_v30 = vsel %vm1646_vm4, %v1645_v47, %v1586_v20 }
 0x1d5   : > { %v1584_v15 = vpop.permute.xlu0 %1583 }
 0x1d6   : > { %v1594_v61 = vpop.permute.xlu1 %1593  ;;  %v1647_v41 = vsel %vm1646_vm4, %v1644_v34, %v1584_v15 }
 0x1d7   : > { %v1651_v49 = vsel %vm1649_vm5, %v1648_v30, %v1594_v61 }
 0x1d9   : > { %v1592_v14 = vpop.permute.xlu0 %1591 }
 0x1da   : > { %v1602_v25 = vpop.permute.xlu1 %1601  ;;  %v1650_v21 = vsel %vm1649_vm5, %v1647_v41, %v1592_v14 }
 0x1db   : > { %v1654_v40 = vsel %vm1652_vm6, %v1651_v49, %v1602_v25 }
 0x1dd   : > { %v1600_v16 = vpop.permute.xlu0 %1599 }
 0x1de   : > { %v1610_v7 = vpop.permute.xlu1 %1609  ;;  %v1653_v37 = vsel %vm1652_vm6, %v1650_v21, %v1600_v16 }
 0x1df   : > { %v1657_v10 = vsel %vm1655_vm7, %v1654_v40, %v1610_v7 }
 0x1e0   : > { %1662 = vrot.lane.b32.xlu1 %v1657_v10, %s2955_s4 }
 0x1e1   : > { %v1608_v38 = vpop.permute.xlu0 %1607 }
 0x1e2   : > { %v1656_v39 = vsel %vm1655_vm7, %v1653_v37, %v1608_v38 }
 0x1e3   : > { %1660 = vrot.lane.b32.xlu0 %v1656_v39, %s2955_s4 }
 0x252   : > { %v1663_v3 = vpop.permute.xlu1 %1662 }
 0x253   : > { %v1667_v4 = vsel %vm1613_vm8, 0.0, %v1663_v3  ;;  %v1669_v5 = vsel %vm1613_vm8, %v1663_v3, 0.0 }
 0x254   : > { %v1724_v45 = vcombine.low %v1667_v4, %v1669_v5  ;;  %v1725_v50 = vcombine.high %v1667_v4, %v1669_v5 }
 0x255   : > { %v1661_v6 = vpop.permute.xlu0 %1660 }
 0x256   : > { %v1732_v51 = vrot.slane %v1724_v45, %v3720_v44  ;;  %v1739_v55 = vrot.slane %v1725_v50, %v3720_v44  ;;  %v1666_v56 = vsel %vm1613_vm8, 0.0, %v1661_v6  ;;  %v1668_v59 = vsel %vm1613_vm8, %v1661_v6, 0.0 }
 0x257   : > { %v1674_v63 = vcombine.low %v1666_v56, %v1668_v59  ;;  %v1675_v28 = vcombine.high %v1666_v56, %v1668_v59  ;;  %vm2207_vm8 = vcmask 97280  }
 0x258   : > { %v1740_v52 = vcombine.high %v1732_v51, %v1732_v51  ;;  %v1741_v12 = vcombine.high %v1739_v55, %v1739_v55  ;;  %v1748_v48 = vrot.slane %v1732_v51, %v3720_v44  ;;  %v1755_v8 = vrot.slane %v1739_v55, %v3720_v44 }
 0x259   : > { %v3737_v23 = vrot.slane %v1674_v63, %v3720_v44  ;;  %v3740_v26 = vrot.slane %v1675_v28, %v3720_v44 }
 0x25a   : > { %v1762_v53 = vrot.slane %v1740_v52, %v3720_v44  ;;  %v1769_v32 = vrot.slane %v1741_v12, %v3720_v44  ;;  %v1770_v1 = vcombine.high %v1748_v48, %v1748_v48  ;;  %v1771_v20 = vcombine.high %v1755_v8, %v1755_v8 }
 0x25b   : > { %v1841_v22 = vrot.slane %v1748_v48, %v3729_v19  ;;  %v1845_v54 = vrot.slane %v1748_v48, %v3732_v31  ;;  %v1873_v57 = vrot.slane %v1755_v8, %v3729_v19  ;;  %v1877_v2 = vrot.slane %v1755_v8, %v3732_v31 }
 0x25c   : > { %v1772_v24 = vcombine.high %v1762_v53, %v1762_v53  ;;  %v1773_v15 = vcombine.high %v1769_v32, %v1769_v32  ;;  %v1849_v60 = vrot.slane %v1762_v53, %v3729_v19  ;;  %v1853_v9 = vrot.slane %v1762_v53, %v3732_v31 }
 0x25d   : > { %v1857_v61 = vrot.slane %v1770_v1, %v3729_v19  ;;  %v1861_v11 = vrot.slane %v1770_v1, %v3732_v31  ;;  %v1881_v35 = vrot.slane %v1769_v32, %v3729_v19  ;;  %v1885_v36 = vrot.slane %v1769_v32, %v3732_v31 }
 0x25e   : > { %v1865_v62 = vrot.slane %v1772_v24, %v3729_v19  ;;  %v1869_v46 = vrot.slane %v1772_v24, %v3732_v31  ;;  %v1889_v13 = vrot.slane %v1771_v20, %v3729_v19  ;;  %v1893_v14 = vrot.slane %v1771_v20, %v3732_v31 }
 0x25f   : > { %v1897_v17 = vrot.slane %v1773_v15, %v3729_v19  ;;  %v1901_v18 = vrot.slane %v1773_v15, %v3732_v31  ;;  %v1950_v25 = vsel %vm253_vm2, %v1841_v22, 0.0  ;;  %v1951_v43 = vsel %vm253_vm2, %v1845_v54, 0.0 }
 0x260   : > { %v1952_v47 = vsel %vm253_vm2, %v1849_v60, 0.0  ;;  %v1953_v29 = vsel %vm253_vm2, %v1853_v9, 0.0  ;;  %v1954_v30 = vsel %vm253_vm2, %v1857_v61, 0.0  ;;  %v1955_v0 = vsel %vm253_vm2, %v1861_v11, 0.0 }
 0x261   : > { %v1956_v49 = vsel %vm253_vm2, %v1865_v62, 0.0  ;;  %v1957_v16 = vsel %vm253_vm2, %v1869_v46, 0.0  ;;  %v1958_v34 = vsel %vm253_vm2, %v1873_v57, 0.0  ;;  %v1959_v40 = vsel %vm253_vm2, %v1877_v2, 0.0 }
 0x262   : > { %v1960_v7 = vsel %vm253_vm2, %v1881_v35, 0.0  ;;  %v1961_v41 = vsel %vm253_vm2, %v1885_v36, 0.0  ;;  %v1962_v10 = vsel %vm253_vm2, %v1889_v13, 0.0  ;;  %v1963_v21 = vsel %vm253_vm2, %v1893_v14, 0.0 }
 0x263   : > { %v1964_v37 = vsel %vm253_vm2, %v1897_v17, 0.0  ;;  %v1965_v38 = vsel %vm253_vm2, %v1901_v18, 0.0  ;;  %v2062_v39 = vcombine.low %v1950_v25, %v1951_v43  ;;  %v2070_v42 = vcombine.low %v1952_v47, %v1953_v29 }
 0x264   : > { %v2078_v58 = vcombine.low %v1954_v30, %v1955_v0  ;;  %v2086_v27 = vcombine.low %v1956_v49, %v1957_v16  ;;  %v2094_v3 = vcombine.low %v1958_v34, %v1959_v40  ;;  %v2102_v4 = vcombine.low %v1960_v7, %v1961_v41 }
 0x265   : > { %v2069_v5 = vrot.slane %v2062_v39, %v3290_v33  ;;  %v2077_v45 = vrot.slane %v2070_v42, %v3290_v33  ;;  %v2110_v50 = vcombine.low %v1962_v10, %v1963_v21  ;;  %v2118_v6 = vcombine.low %v1964_v37, %v1965_v38 }
 0x266   : > { %v2085_v51 = vrot.slane %v2078_v58, %v3290_v33  ;;  %v2093_v55 = vrot.slane %v2086_v27, %v3290_v33  ;;  %v2101_v56 = vrot.slane %v2094_v3, %v3290_v33  ;;  %v2109_v59 = vrot.slane %v2102_v4, %v3290_v33 }
 0x267   : > { %v2117_v63 = vrot.slane %v2110_v50, %v3290_v33  ;;  %v2125_v28 = vrot.slane %v2118_v6, %v3290_v33  ;;  %v2162_v52 = vcombine.low %v2069_v5, %v2077_v45  ;;  %v1690_v12 = vcombine.high %v3737_v23, %v3737_v23 }
 0x268   : > { %v2163_v48 = vcombine.low %v2085_v51, %v2093_v55  ;;  %v2180_v8 = vcombine.low %v2101_v56, %v2109_v59  ;;  %v1691_v53 = vcombine.high %v3740_v26, %v3740_v26  ;;  %v1698_v32 = vrot.slane %v3737_v23, %v3720_v44 }
 0x269   : > { %v2170_v1 = vrot.slane %v2162_v52, %v3290_v33  ;;  %v2181_v20 = vcombine.low %v2117_v63, %v2125_v28  ;;  %v1705_v22 = vrot.slane %v3740_v26, %v3720_v44  ;;  %v1712_v54 = vrot.slane %v1690_v12, %v3720_v44 }
 0x26a   : > { %v2177_v57 = vrot.slane %v2163_v48, %v3290_v33  ;;  %v2188_v2 = vrot.slane %v2180_v8, %v3290_v33  ;;  %v1719_v24 = vrot.slane %v1691_v53, %v3720_v44  ;;  %v1720_v15 = vcombine.high %v1698_v32, %v1698_v32 }
 0x26b   : > { %v2195_v60 = vrot.slane %v2181_v20, %v3290_v33  ;;  %v1721_v9 = vcombine.high %v1705_v22, %v1705_v22  ;;  %v1722_v61 = vcombine.high %v1712_v54, %v1712_v54  ;;  %v1777_v23 = vrot.slane %v1698_v32, %v3729_v19 }
 0x26c   : > { %v2178_v11 = vcombine.low %v2170_v1, %v2177_v57  ;;  %v2179_v35 = vcombine.high %v2170_v1, %v2177_v57  ;;  %v1723_v36 = vcombine.high %v1719_v24, %v1719_v24  ;;  %v1781_v26 = vrot.slane %v1698_v32, %v3732_v31 }
 0x26d   : > { %v2196_v62 = vcombine.low %v2188_v2, %v2195_v60  ;;  %v2197_v46 = vcombine.high %v2188_v2, %v2195_v60  ;;  %v1785_v13 = vrot.slane %v1712_v54, %v3729_v19  ;;  %v1789_v14 = vrot.slane %v1712_v54, %v3732_v31 }
 0x26e   : > { %2211 = vst [vmem:[%s3803_s3 + $0x20] sm:$0xff] %v2178_v11  ;;  %2212 = vst.msk [vmem:[%s3803_s3 + $0x28] sm:$0xff] %vm2207_vm8, %v2179_v35  ;;  %v1793_v44 = vrot.slane %v1720_v15, %v3729_v19  ;;  %v1797_v17 = vrot.slane %v1720_v15, %v3732_v31  ;;  %v1801_v18 = vrot.slane %v1722_v61, %v3729_v19  ;;  %v1934_v40 = vsel %vm253_vm2, %v1777_v23, 0.0 }
 0x26f   : > { %v1805_v25 = vrot.slane %v1722_v61, %v3732_v31  ;;  %2213 = vst [vmem:[%s3803_s3 + $0x30] sm:$0xff] %v2196_v62  ;;  %2214 = vst.msk [vmem:[%s3803_s3 + $0x38] sm:$0xff] %vm2207_vm8, %v2197_v46  ;;  %v1809_v43 = vrot.slane %v1705_v22, %v3729_v19  ;;  %v1813_v47 = vrot.slane %v1705_v22, %v3732_v31  ;;  %v1935_v7 = vsel %vm253_vm2, %v1781_v26, 0.0 }
 0x270   : > { %v1817_v29 = vrot.slane %v1719_v24, %v3729_v19  ;;  %v1821_v30 = vrot.slane %v1719_v24, %v3732_v31  ;;  %v1825_v0 = vrot.slane %v1721_v9, %v3729_v19  ;;  %v1829_v49 = vrot.slane %v1721_v9, %v3732_v31 }
 0x271   : > { %v1833_v16 = vrot.slane %v1723_v36, %v3729_v19  ;;  %v1837_v34 = vrot.slane %v1723_v36, %v3732_v31  ;;  %v1936_v41 = vsel %vm253_vm2, %v1785_v13, 0.0  ;;  %v1937_v10 = vsel %vm253_vm2, %v1789_v14, 0.0 }
 0x272   : > { %v1938_v21 = vsel %vm253_vm2, %v1793_v44, 0.0  ;;  %v1939_v37 = vsel %vm253_vm2, %v1797_v17, 0.0  ;;  %v1940_v38 = vsel %vm253_vm2, %v1801_v18, 0.0  ;;  %v1941_v39 = vsel %vm253_vm2, %v1805_v25, 0.0 }
 0x273   : > { %v1942_v19 = vsel %vm253_vm2, %v1809_v43, 0.0  ;;  %v1943_v31 = vsel %vm253_vm2, %v1813_v47, 0.0  ;;  %v1944_v42 = vsel %vm253_vm2, %v1817_v29, 0.0  ;;  %v1945_v58 = vsel %vm253_vm2, %v1821_v30, 0.0 }
 0x274   : > { %v1946_v27 = vsel %vm253_vm2, %v1825_v0, 0.0  ;;  %v1947_v3 = vsel %vm253_vm2, %v1829_v49, 0.0  ;;  %v1948_v4 = vsel %vm253_vm2, %v1833_v16, 0.0  ;;  %v1949_v5 = vsel %vm253_vm2, %v1837_v34, 0.0 }
 0x275   : > { %v1998_v45 = vcombine.low %v1934_v40, %v1935_v7  ;;  %v2006_v50 = vcombine.low %v1936_v41, %v1937_v10  ;;  %v2014_v6 = vcombine.low %v1938_v21, %v1939_v37  ;;  %v2022_v51 = vcombine.low %v1940_v38, %v1941_v39 }
 0x276   : > { %v2030_v55 = vcombine.low %v1942_v19, %v1943_v31  ;;  %v2038_v56 = vcombine.low %v1944_v42, %v1945_v58  ;;  %v2046_v59 = vcombine.low %v1946_v27, %v1947_v3  ;;  %v2054_v63 = vcombine.low %v1948_v4, %v1949_v5 }
 0x277   : > { %v2005_v28 = vrot.slane %v1998_v45, %v3290_v33  ;;  %v2013_v52 = vrot.slane %v2006_v50, %v3290_v33  ;;  %v2021_v12 = vrot.slane %v2014_v6, %v3290_v33  ;;  %v2029_v48 = vrot.slane %v2022_v51, %v3290_v33 }
 0x278   : > { %v2037_v8 = vrot.slane %v2030_v55, %v3290_v33  ;;  %v2045_v53 = vrot.slane %v2038_v56, %v3290_v33  ;;  %v2053_v32 = vrot.slane %v2046_v59, %v3290_v33  ;;  %v2061_v1 = vrot.slane %v2054_v63, %v3290_v33 }
 0x279   : > { %v2126_v20 = vcombine.low %v2005_v28, %v2013_v52  ;;  %v2127_v22 = vcombine.low %v2021_v12, %v2029_v48 }
 0x27a   : > { %v2144_v54 = vcombine.low %v2037_v8, %v2045_v53  ;;  %v2145_v57 = vcombine.low %v2053_v32, %v2061_v1  ;;  %2221 = sbr.rel (!%p3994_p5) target bundleno = 690 (0x2b2), region = 40 }
 0x27b   : > { %v2134_v2 = vrot.slane %v2126_v20, %v3290_v33  ;;  %v2141_v24 = vrot.slane %v2127_v22, %v3290_v33 }
 0x27c   : > { %v2152_v15 = vrot.slane %v2144_v54, %v3290_v33  ;;  %v2159_v60 = vrot.slane %v2145_v57, %v3290_v33 }
 0x27d   : > { %v2142_v9 = vcombine.low %v2134_v2, %v2141_v24  ;;  %v2143_v61 = vcombine.high %v2134_v2, %v2141_v24 }
 0x27e   : > { %v2160_v23 = vcombine.low %v2152_v15, %v2159_v60  ;;  %v2161_v11 = vcombine.high %v2152_v15, %v2159_v60 }
 0x27f   : > { %2206 = vst [vmem:[%s3803_s3] sm:$0xff] %v2142_v9  ;;  %2208 = vst.msk [vmem:[%s3803_s3 + $0x8] sm:$0xff] %vm2207_vm8, %v2143_v61 }
 0x280   : > { %2209 = vst [vmem:[%s3803_s3 + $0x10] sm:$0xff] %v2160_v23  ;;  %2210 = vst.msk [vmem:[%s3803_s3 + $0x18] sm:$0xff] %vm2207_vm8, %v2161_v11 }
 0x281   : > { %s4024_s30 = smov (!%p2224_p2, %s2223_s30), 4 }
 0x282   : > { %s2484_s28 = sshll.u32 %s4024_s30, 8 }
 0x283   : > { %p2472_p8 = scmp.eq.s32.totalorder %s2484_s28, 0 }
 0x284   : > { %s3871_s22 = sshrl.u32 (!%p2472_p8), %s4024_s30, 2 }
 0x285   : > { %2236 = sbr.rel (%p2472_p8) target bundleno = 690 (0x2b2), region = 44  ;;  %p2473_p12 = scmp.le.s32.totalorder (!%p2472_p8), %s3871_s22, 0 }
 0x28c   : > { %2375 = sbr.rel (%p2473_p12) target bundleno = 669 (0x29d), region = 107  ;;  %s3995_s17 = smov (!%p2473_p12), %s3868_s23 }
 0x28d   : > { %s3996_s18 = smov (!%p2473_p12), %s3803_s3  ;;  %s3880_s24 = smov (!%p2473_p12), 0  }
 0x28e   : > { %s3882_s27 = smov (!%p2473_p12), 0  }
 0x293 LB: >> { %v2249_v33 = vld [vmem:[%s2908_s18] sm:$0xff]  ;;  %v2251_v35 = vld [vmem:[%s2908_s18 + $0x10] sm:$0xff]  ;;  %s2265_s0 = sadd.s32 1, %s2912_s24  ;;  %v2257_v62 = vld [vmem:[%s2908_s18 + $0x8] sm:$0xff]  ;;  %s2243_s27 = sadd.s32 1, %s2916_s27   ;;  %s2916_s27 = sphi %s3882_s27, %s2243_s27   ;;  %s2912_s24 = sphi %s3880_s24, %s3997_s24   ;;  %s2908_s18 = sphi %s3996_s18, %s2270_s18   ;;  %s2904_s17 = sphi %s3995_s17, %s2271_s17  }
 0x294   : >> { %v2253_v36 = vld [vmem:[%s2908_s18 + $0x20] sm:$0xff]  ;;  %2250 = vst [vmem:[%s2904_s17] sm:$0xff] %v2249_v33  ;;  %2252 = vst [vmem:[%s2904_s17 + $0x10] sm:$0xff] %v2251_v35  ;;  %v2255_v26 = vld [vmem:[%s2908_s18 + $0x30] sm:$0xff]  ;;  %p2266_p3 = scmp.ge.s32.totalorder %s2265_s0, %s3871_s22  ;;  %p2242_p0 = scmp.ge.s32.totalorder %s2243_s27, %s3871_s22 }
 0x295   : >> { %2254 = vst [vmem:[%s2904_s17 + $0x20] sm:$0xff] %v2253_v36  ;;  %v2259_v46 = vld [vmem:[%s2908_s18 + $0x18] sm:$0xff]  ;;  %2256 = vst [vmem:[%s2904_s17 + $0x30] sm:$0xff] %v2255_v26  ;;  %v2261_v13 = vld [vmem:[%s2908_s18 + $0x28] sm:$0xff] }
 0x296   : >> { %2258 = vst [vmem:[%s2904_s17 + $0x8] sm:$0xff] %v2257_v62  ;;  %2260 = vst [vmem:[%s2904_s17 + $0x18] sm:$0xff] %v2259_v46  ;;  %v2263_v14 = vld [vmem:[%s2908_s18 + $0x38] sm:$0xff]  ;;  %s4026_s0 = smov (%p2266_p3, %s2265_s0), 0  ;;  %2245 = sbr.rel (!%p2242_p0) target bundleno = 659 (0x293), region = 113 }
 0x297   : >> { %2262 = vst [vmem:[%s2904_s17 + $0x28] sm:$0xff] %v2261_v13  ;;  %2264 = vst [vmem:[%s2904_s17 + $0x38] sm:$0xff] %v2263_v14  ;;  %s2474_s19 = sshll.u32 %s4026_s0, 6  ;;  %s3997_s24 = smov %s4026_s0 }
 0x298   : >> { %s2270_s18 = scalar_lea.vmem %s3803_s3, %s2474_s19 [#allocation6]   ;;  %s2271_s17 = scalar_lea.vmem %s3868_s23, %s2474_s19  }
 0x29d PF: > { %s3901_s11 = sand.u32 3, %s4024_s30   ;;  %s2486_s25 = sshll.u32 %s3871_s22, 6 }
 0x29e   : > { %s3905_s9 = scalar_lea.vmem %s3803_s3, %s2486_s25 [#allocation6]   ;;  %s2278_s7 = scalar_lea.vmem %s3868_s23, %s2486_s25  }
 0x29f   : > { %p2479_p4 = scmp.le.s32.totalorder %s3901_s11, 0 }
 0x2a0   : > { %s2918_s16 = smov (!%p2479_p4), %s2278_s7   ;;  %s2922_s5 = smov (!%p2479_p4), %s3905_s9  }
 0x2a1   : > { %2389 = sbr.rel (%p2479_p4) target bundleno = 690 (0x2b2), region = 118  ;;  %s2926_s29 = smov (!%p2479_p4), 0  }
 0x2a2   : > { %s2930_s6 = smov (!%p2479_p4), 0  }
 0x2a8 LB: >> { %v2288_v44 = vld [vmem:[%s2924_s5] sm:$0xff]  ;;  %v2290_v17 = vld [vmem:[%s2924_s5 + $0x8] sm:$0xff]  ;;  %s2292_s3 = sadd.s32 1, %s2928_s29  ;;  %s2282_s6 = sadd.s32 1, %s2932_s6   ;;  %s2932_s6 = sphi %s2930_s6, %s2282_s6   ;;  %s2928_s29 = sphi %s2926_s29, %s2927_s29   ;;  %s2924_s5 = sphi %s2922_s5, %s2297_s5   ;;  %s2920_s16 = sphi %s2918_s16, %s2298_s16  }
 0x2a9   : >> { %2289 = vst [vmem:[%s2920_s16] sm:$0xff] %v2288_v44  ;;  %2291 = vst [vmem:[%s2920_s16 + $0x8] sm:$0xff] %v2290_v17  ;;  %p2293_p10 = scmp.ge.s32.totalorder %s2292_s3, %s3901_s11  ;;  %p2281_p1 = scmp.ge.s32.totalorder %s2282_s6, %s3901_s11 }
 0x2ab   : >> { %s4028_s3 = smov (%p2293_p10, %s2292_s3), 0  ;;  %2284 = sbr.rel (!%p2281_p1) target bundleno = 680 (0x2a8), region = 124 }
 0x2ac   : >> { %s2480_s30 = sshll.u32 %s4028_s3, 4  ;;  %s2927_s29 = smov %s4028_s3  }
 0x2ad   : >> { %s2297_s5 = scalar_lea.vmem %s3905_s9, %s2480_s30 [#allocation6]   ;;  %s2298_s16 = scalar_lea.vmem %s2278_s7, %s2480_s30  }
 0x2b2 PF: > { %s18_s21 = sadd.s32 1, %s2900_s21   ;;  %s3999_s4 = sld [smem:[#allocation9_spill]] }
 0x2b3   : > { %p3914_p13 = scmp.ge.s32.totalorder %s18_s21, 6   ;;  %s4000_s16 = sld [smem:[#allocation13_spill]] }
 0x2b4   : > { %s4001_s17 = sld [smem:[#allocation10_spill]]  ;;  %s4002_s19 = sld [smem:[#allocation11_spill]] }
 0x2b5   : > { %s4003_s23 = sld [smem:[#allocation12_spill]]  ;;  %s4004_s9 = smov %s2856_s10 }
 0x2b6   : > { %s4005_s10 = smov %s3169_s8  ;;  %s4006_s11 = smov %s2864_s12 }
 0x2b7   : > { %s4007_s12 = smov %s2868_s13  ;;  %s4008_s13 = smov %s3166_s26 }
 0x2b8   : > { %s4009_s14 = smov %s2876_s15  ;;  %s4010_s15 = smov %s3999_s4 }
 0x2b9   : > { %s4011_s18 = smov %s2896_s20  ;;  %17 = sbr.rel (!%p3914_p13) target bundleno = 12 (0xc), region = 135 }
 0x2bb   : > { %s4012_s20 = smov %s4003_s23 }
 0x2c0   :  { %2314 = vsyncpa [#allocation3], 1 }
 0x2c1   :  { %2316 = vsyncpa [#allocation3 + $0x1], 1 }
 0x2c2   :  { %2317 = vsyncpa [#allocation5], 1 }
 0x2c3   :  { %2319 = vsyncpa [#allocation5 + $0x1], 1 }

</bundles_post_ra>
